<compile_context>
chip_gen: v5e
topology: v5e:2x2
jax: 0.10.0
libtpu: 0.0.40
codegen_flags: <defaults>
</compile_context>

<pallas_src>
import functools

import jax
import jax.numpy as jnp
from jax.experimental import pallas as pl
from jax.experimental.pallas import tpu as pltpu


def _rup8(n):
    return ((n + 7) // 8) * 8


def _lstm_cell(gates_scaled, c_prev, H):
    """PyTorch gate order [i, f, g, o].

    The i/f/o gate columns of the weights and biases were pre-scaled by 0.5 on
    the host, so a SINGLE full-vreg tanh yields every activation:
        sigmoid(x) = 0.5 * tanh(x/2) + 0.5.
    """
    t = jnp.tanh(gates_scaled)                     # one EUP push, (B, 4H) vreg
    i_g = 0.5 * t[:, 0 * H:1 * H] + 0.5
    f_g = 0.5 * t[:, 1 * H:2 * H] + 0.5
    g_g = t[:, 2 * H:3 * H]
    o_g = 0.5 * t[:, 3 * H:4 * H] + 0.5
    c_new = f_g * c_prev + i_g * g_g
    h_new = o_g * jnp.tanh(c_new)                  # second (and last) EUP push
    return h_new, c_new


def _fused_lstm_fc_kernel(x_ref, w_ref, out_ref, *,
                          seq_len, input_size, hidden_size):
    """Two stacked LSTM layers + final FC in a single kernel invocation.

    x_ref:  (S*B, In) time-major input, flattened (VMEM)
    w_ref:  packed weight slab (rows, 4H):
              [wih0_t | whh0_t | w1cat_t | tail(b0,b1,wfc,bfc,...)]
    out_ref:(B, 1)
    """
    B = out_ref.shape[0]
    H = hidden_size
    In = input_size
    GW = 4 * H

    # ---- static-offset views into the packed weight slab (one DMA) --------
    o_wih0 = 0
    o_whh0 = o_wih0 + _rup8(In)
    o_w1 = o_whh0 + _rup8(H)
    o_tail = o_w1 + _rup8(2 * H)

    wih0 = w_ref[o_wih0:o_wih0 + In, :]           # (In, 4H), i/f/o cols pre-scaled
    whh0 = w_ref[o_whh0:o_whh0 + H, :]            # (H, 4H)
    w1cat = w_ref[o_w1:o_w1 + 2 * H, :]           # (2H, 4H) = [wih1_t ; whh1_t]
    tail = w_ref[o_tail:o_tail + 8, :]            # aligned (8, 4H) load
    b0 = tail[0:1, :]                             # (1, 4H)
    b1 = jnp.broadcast_to(tail[1:2, :], (B, GW))  # hoisted bias broadcast
    wfc = tail[2:3, 0:H]                          # (1, H)
    bfc = tail[3:4, 0:1]                          # (1, 1)

    # ---- hoisted, loop-invariant work --------------------------------------
    # Layer-0 input projection + bias for ALL timesteps in ONE MXU call.
    xw0 = jnp.dot(x_ref[...], wih0,
                  preferred_element_type=jnp.float32) + b0      # (S*B, 4H)

    zeros = jnp.zeros((B, H), jnp.float32)
    h0, c0, h1, c1 = zeros, zeros, zeros, zeros   # h0 = c0 = 0 (PyTorch)

    # Fully unrolled time loop; states live in vregs; intermediate hidden
    # sequences never leave the kernel.  2 MXU pushes + 4 EUP pushes per step.
    for t in range(seq_len):
        # Layer 0: only the recurrent matmul sits on the serial path.
        gates0 = xw0[t * B:(t + 1) * B, :] + jnp.dot(
            h0, whh0, preferred_element_type=jnp.float32)
        h0, c0 = _lstm_cell(gates0, c0, H)

        # Layer 1: single merged (B,2H)x(2H,4H) dot for input + recurrent.
        hcat = jnp.concatenate([h0, h1], axis=1)            # in-vreg lane concat
        gates1 = jnp.dot(hcat, w1cat,
                         preferred_element_type=jnp.float32) + b1
        h1, c1 = _lstm_cell(gates1, c1, H)

    # Final Linear(hidden, 1): VPU broadcast-mul + lane reduce (no N=1 MXU push).
    out_ref[...] = jnp.sum(h1 * wfc, axis=-1, keepdims=True) + bfc


def lstm_parameter_regression_forward(x, w_slab):
    """x: (S, B, In) float32, packed weight slab -> (B, 1) float32."""
    S, B, In = x.shape
    H = w_slab.shape[1] // 4

    # Pad batch to a full 8-sublane group for full vreg occupancy.
    B_pad = max(8, ((B + 7) // 8) * 8)
    if B_pad != B:
        x = jnp.pad(x, ((0, 0), (0, B_pad - B), (0, 0)))
    x_flat = x.reshape(S * B_pad, In)

    out = pl.pallas_call(
        functools.partial(_fused_lstm_fc_kernel, seq_len=S,
                          input_size=In, hidden_size=H),
        out_shape=jax.ShapeDtypeStruct((B_pad, 1), jnp.float32),
        in_specs=[pl.BlockSpec(memory_space=pltpu.MemorySpace.VMEM),
                  pl.BlockSpec(memory_space=pltpu.MemorySpace.VMEM)],
        out_specs=pl.BlockSpec(memory_space=pltpu.MemorySpace.VMEM),
    )(x_flat, w_slab)
    return out[:B]


# ---------------------------------------------------------------------------
# Parameter construction (init_network: xavier_uniform weights, zero biases)
# ---------------------------------------------------------------------------
def xavier_uniform(key, shape):
    fan_out, fan_in = shape  # PyTorch weight shape (out, in)
    bound = (6.0 / (fan_in + fan_out)) ** 0.5
    return jax.random.uniform(key, shape, jnp.float32, -bound, bound)


def make_params(key, input_size, hidden_size):
    """Raw (un-folded) transposed parameters, as after init_network()."""
    k = jax.random.split(key, 5)
    w_ih0 = xavier_uniform(k[0], (4 * hidden_size, input_size))
    w_hh0 = xavier_uniform(k[1], (4 * hidden_size, hidden_size))
    w_ih1 = xavier_uniform(k[2], (4 * hidden_size, hidden_size))
    w_hh1 = xavier_uniform(k[3], (4 * hidden_size, hidden_size))
    w_fc = xavier_uniform(k[4], (1, hidden_size))
    zero_b = jnp.zeros((1, 4 * hidden_size), jnp.float32)  # b_ih + b_hh = 0
    # NOTE: when loading real PyTorch weights, b0/b1 must be b_ih + b_hh.
    return {
        "wih0_t": w_ih0.T, "whh0_t": w_hh0.T, "b0": zero_b,
        "wih1_t": w_ih1.T, "whh1_t": w_hh1.T, "b1": zero_b,
        "wfc_t": w_fc.T, "bfc": jnp.zeros((1, 1), jnp.float32),
    }


def pack_params(p, input_size, hidden_size):
    """Fold the sigmoid-as-tanh 0.5 scale into the i/f/o gate columns and pack
    every parameter into one contiguous, sublane-aligned (rows, 4H) f32 slab
    (a single HBM->VMEM DMA at kernel launch)."""
    H, In = hidden_size, input_size
    GW = 4 * H

    # PyTorch gate order [i, f, g, o]: scale i/f/o columns by 0.5, keep g.
    scale = jnp.concatenate([
        jnp.full((H,), 0.5), jnp.full((H,), 0.5),
        jnp.ones((H,)), jnp.full((H,), 0.5)]).astype(jnp.float32)[None, :]

    def pad_rows(a, rows):
        return jnp.pad(a, ((0, rows - a.shape[0]), (0, 0)))

    wih0 = pad_rows(p["wih0_t"] * scale, _rup8(In))
    whh0 = pad_rows(p["whh0_t"] * scale, _rup8(H))
    w1cat = pad_rows(
        jnp.concatenate([p["wih1_t"], p["whh1_t"]], axis=0) * scale,
        _rup8(2 * H))
    b0 = p["b0"] * scale
    b1 = p["b1"] * scale
    wfc_row = jnp.pad(p["wfc_t"].T, ((0, 0), (0, GW - H)))   # (1, GW)
    bfc_row = jnp.pad(p["bfc"], ((0, 0), (0, GW - 1)))       # (1, GW)
    tail = jnp.concatenate(
        [b0, b1, wfc_row, bfc_row, jnp.zeros((4, GW), jnp.float32)], axis=0)
    return jnp.concatenate([wih0, whh0, w1cat, tail],
                           axis=0).astype(jnp.float32)


# ---------------------------------------------------------------------------
# Pure-JAX reference for a correctness check
# ---------------------------------------------------------------------------
def ref_forward(x, p):
    S, B, _ = x.shape
    H = p["whh0_t"].shape[0]

    def cell(g, c):
        i = jax.nn.sigmoid(g[:, :H])
        f = jax.nn.sigmoid(g[:, H:2 * H])
        gg = jnp.tanh(g[:, 2 * H:3 * H])
        o = jax.nn.sigmoid(g[:, 3 * H:])
        c = f * c + i * gg
        return o * jnp.tanh(c), c

    h0 = c0 = h1 = c1 = jnp.zeros((B, H), jnp.float32)
    for t in range(S):
        h0, c0 = cell(x[t] @ p["wih0_t"] + h0 @ p["whh0_t"] + p["b0"], c0)
        h1, c1 = cell(h0 @ p["wih1_t"] + h1 @ p["whh1_t"] + p["b1"], c1)
    return h1 @ p["wfc_t"] + p["bfc"]


if __name__ == "__main__":
    SEQ, BATCH, INPUT, HIDDEN = 8, 4, 16, 32

    key = jax.random.PRNGKey(0)
    kx, kp = jax.random.split(key)
    x = jax.random.normal(kx, (SEQ, BATCH, INPUT), jnp.float32)
    params = make_params(kp, INPUT, HIDDEN)
    w_slab = pack_params(params, INPUT, HIDDEN)

    fwd = jax.jit(lstm_parameter_regression_forward)
    out = jax.block_until_ready(fwd(x, w_slab))
    assert out.shape == (BATCH, 1), out.shape

    ref = ref_forward(x, params)
    assert jnp.allclose(out, ref, atol=2e-5, rtol=1e-5), (
        "mismatch vs reference", out, ref)

    print("KERNEL_OK")
</pallas_src>

<mosaic_0001>
module attributes {stable_mosaic.version = 11 : i64} {
  func.func @_fused_lstm_fc_kernel(%arg0: memref<64x16xf32, #tpu.memory_space<vmem>>, %arg1: memref<120x128xf32, #tpu.memory_space<vmem>>, %arg2: memref<8x1xf32, #tpu.memory_space<vmem>>) attributes {dimension_semantics = [], scalar_prefetch = 0 : i64, scratch_operands = 0 : i64, tpu.core_type = #tpu.core_type<tc>} {
    %c0 = arith.constant 0 : index
    %c0_0 = arith.constant 0 : index
    %0 = vector.load %arg1[%c0, %c0_0] : memref<120x128xf32, #tpu.memory_space<vmem>>, vector<16x128xf32>
    %c16 = arith.constant 16 : index
    %c0_1 = arith.constant 0 : index
    %1 = vector.load %arg1[%c16, %c0_1] : memref<120x128xf32, #tpu.memory_space<vmem>>, vector<32x128xf32>
    %c48 = arith.constant 48 : index
    %c0_2 = arith.constant 0 : index
    %2 = vector.load %arg1[%c48, %c0_2] : memref<120x128xf32, #tpu.memory_space<vmem>>, vector<64x128xf32>
    %c112 = arith.constant 112 : index
    %c0_3 = arith.constant 0 : index
    %3 = vector.load %arg1[%c112, %c0_3] : memref<120x128xf32, #tpu.memory_space<vmem>>, vector<8x128xf32>
    %4 = vector.extract_strided_slice %3 {offsets = [0, 0], sizes = [1, 128], strides = [1, 1]} : vector<8x128xf32> to vector<1x128xf32>
    %5 = vector.extract_strided_slice %3 {offsets = [1, 0], sizes = [1, 128], strides = [1, 1]} : vector<8x128xf32> to vector<1x128xf32>
    %6 = vector.shape_cast %5 : vector<1x128xf32> to vector<1x128xf32>
    %7 = vector.broadcast %6 : vector<1x128xf32> to vector<8x128xf32>
    %8 = vector.extract_strided_slice %3 {offsets = [2, 0], sizes = [1, 32], strides = [1, 1]} : vector<8x128xf32> to vector<1x32xf32>
    %9 = vector.extract_strided_slice %3 {offsets = [3, 0], sizes = [1, 1], strides = [1, 1]} : vector<8x128xf32> to vector<1x1xf32>
    %c0_4 = arith.constant 0 : index
    %c0_5 = arith.constant 0 : index
    %10 = vector.load %arg0[%c0_4, %c0_5] : memref<64x16xf32, #tpu.memory_space<vmem>>, vector<64x16xf32>
    %cst = arith.constant dense<0.000000e+00> : vector<64x128xf32>
    %11 = tpu.matmul %10, %0, %cst {dimension_numbers = #tpu.dot_dimension_numbers<[1], [0], [0], [1], [0, 0, 1, 1], [], []>} : vector<64x16xf32>, vector<16x128xf32>, vector<64x128xf32> -> vector<64x128xf32>
    %12 = vector.broadcast %4 : vector<1x128xf32> to vector<64x128xf32>
    %13 = arith.addf %11, %12 : vector<64x128xf32>
    %cst_6 = arith.constant 0.000000e+00 : f32
    %14 = vector.broadcast %cst_6 : f32 to vector<8x32xf32>
    %15 = vector.extract_strided_slice %13 {offsets = [0, 0], sizes = [8, 128], strides = [1, 1]} : vector<64x128xf32> to vector<8x128xf32>
    %cst_7 = arith.constant dense<0.000000e+00> : vector<8x128xf32>
    %16 = tpu.matmul %14, %1, %cst_7 {dimension_numbers = #tpu.dot_dimension_numbers<[1], [0], [0], [1], [0, 0, 1, 1], [], []>} : vector<8x32xf32>, vector<32x128xf32>, vector<8x128xf32> -> vector<8x128xf32>
    %17 = arith.addf %15, %16 : vector<8x128xf32>
    %18 = math.tanh %17 : vector<8x128xf32>
    %19 = vector.extract_strided_slice %18 {offsets = [0, 0], sizes = [8, 32], strides = [1, 1]} : vector<8x128xf32> to vector<8x32xf32>
    %cst_8 = arith.constant 5.000000e-01 : f32
    %20 = vector.broadcast %cst_8 : f32 to vector<8x32xf32>
    %21 = arith.mulf %20, %19 : vector<8x32xf32>
    %cst_9 = arith.constant 5.000000e-01 : f32
    %22 = vector.broadcast %cst_9 : f32 to vector<8x32xf32>
    %23 = arith.addf %21, %22 : vector<8x32xf32>
    %24 = vector.extract_strided_slice %18 {offsets = [0, 32], sizes = [8, 32], strides = [1, 1]} : vector<8x128xf32> to vector<8x32xf32>
    %cst_10 = arith.constant 5.000000e-01 : f32
    %25 = vector.broadcast %cst_10 : f32 to vector<8x32xf32>
    %26 = arith.mulf %25, %24 : vector<8x32xf32>
    %cst_11 = arith.constant 5.000000e-01 : f32
    %27 = vector.broadcast %cst_11 : f32 to vector<8x32xf32>
    %28 = arith.addf %26, %27 : vector<8x32xf32>
    %29 = vector.extract_strided_slice %18 {offsets = [0, 64], sizes = [8, 32], strides = [1, 1]} : vector<8x128xf32> to vector<8x32xf32>
    %30 = vector.extract_strided_slice %18 {offsets = [0, 96], sizes = [8, 32], strides = [1, 1]} : vector<8x128xf32> to vector<8x32xf32>
    %cst_12 = arith.constant 5.000000e-01 : f32
    %31 = vector.broadcast %cst_12 : f32 to vector<8x32xf32>
    %32 = arith.mulf %31, %30 : vector<8x32xf32>
    %cst_13 = arith.constant 5.000000e-01 : f32
    %33 = vector.broadcast %cst_13 : f32 to vector<8x32xf32>
    %34 = arith.addf %32, %33 : vector<8x32xf32>
    %35 = arith.mulf %28, %14 : vector<8x32xf32>
    %36 = arith.mulf %23, %29 : vector<8x32xf32>
    %37 = arith.addf %35, %36 : vector<8x32xf32>
    %38 = math.tanh %37 : vector<8x32xf32>
    %39 = arith.mulf %34, %38 : vector<8x32xf32>
    %40 = tpu.concatenate %39, %14 in 1 : vector<8x32xf32>, vector<8x32xf32> -> vector<8x64xf32>
    %cst_14 = arith.constant dense<0.000000e+00> : vector<8x128xf32>
    %41 = tpu.matmul %40, %2, %cst_14 {dimension_numbers = #tpu.dot_dimension_numbers<[1], [0], [0], [1], [0, 0, 1, 1], [], []>} : vector<8x64xf32>, vector<64x128xf32>, vector<8x128xf32> -> vector<8x128xf32>
    %42 = arith.addf %41, %7 : vector<8x128xf32>
    %43 = math.tanh %42 : vector<8x128xf32>
    %44 = vector.extract_strided_slice %43 {offsets = [0, 0], sizes = [8, 32], strides = [1, 1]} : vector<8x128xf32> to vector<8x32xf32>
    %cst_15 = arith.constant 5.000000e-01 : f32
    %45 = vector.broadcast %cst_15 : f32 to vector<8x32xf32>
    %46 = arith.mulf %45, %44 : vector<8x32xf32>
    %cst_16 = arith.constant 5.000000e-01 : f32
    %47 = vector.broadcast %cst_16 : f32 to vector<8x32xf32>
    %48 = arith.addf %46, %47 : vector<8x32xf32>
    %49 = vector.extract_strided_slice %43 {offsets = [0, 32], sizes = [8, 32], strides = [1, 1]} : vector<8x128xf32> to vector<8x32xf32>
    %cst_17 = arith.constant 5.000000e-01 : f32
    %50 = vector.broadcast %cst_17 : f32 to vector<8x32xf32>
    %51 = arith.mulf %50, %49 : vector<8x32xf32>
    %cst_18 = arith.constant 5.000000e-01 : f32
    %52 = vector.broadcast %cst_18 : f32 to vector<8x32xf32>
    %53 = arith.addf %51, %52 : vector<8x32xf32>
    %54 = vector.extract_strided_slice %43 {offsets = [0, 64], sizes = [8, 32], strides = [1, 1]} : vector<8x128xf32> to vector<8x32xf32>
    %55 = vector.extract_strided_slice %43 {offsets = [0, 96], sizes = [8, 32], strides = [1, 1]} : vector<8x128xf32> to vector<8x32xf32>
    %cst_19 = arith.constant 5.000000e-01 : f32
    %56 = vector.broadcast %cst_19 : f32 to vector<8x32xf32>
    %57 = arith.mulf %56, %55 : vector<8x32xf32>
    %cst_20 = arith.constant 5.000000e-01 : f32
    %58 = vector.broadcast %cst_20 : f32 to vector<8x32xf32>
    %59 = arith.addf %57, %58 : vector<8x32xf32>
    %60 = arith.mulf %53, %14 : vector<8x32xf32>
    %61 = arith.mulf %48, %54 : vector<8x32xf32>
    %62 = arith.addf %60, %61 : vector<8x32xf32>
    %63 = math.tanh %62 : vector<8x32xf32>
    %64 = arith.mulf %59, %63 : vector<8x32xf32>
    %65 = vector.extract_strided_slice %13 {offsets = [8, 0], sizes = [8, 128], strides = [1, 1]} : vector<64x128xf32> to vector<8x128xf32>
    %cst_21 = arith.constant dense<0.000000e+00> : vector<8x128xf32>
    %66 = tpu.matmul %39, %1, %cst_21 {dimension_numbers = #tpu.dot_dimension_numbers<[1], [0], [0], [1], [0, 0, 1, 1], [], []>} : vector<8x32xf32>, vector<32x128xf32>, vector<8x128xf32> -> vector<8x128xf32>
    %67 = arith.addf %65, %66 : vector<8x128xf32>
    %68 = math.tanh %67 : vector<8x128xf32>
    %69 = vector.extract_strided_slice %68 {offsets = [0, 0], sizes = [8, 32], strides = [1, 1]} : vector<8x128xf32> to vector<8x32xf32>
    %cst_22 = arith.constant 5.000000e-01 : f32
    %70 = vector.broadcast %cst_22 : f32 to vector<8x32xf32>
    %71 = arith.mulf %70, %69 : vector<8x32xf32>
    %cst_23 = arith.constant 5.000000e-01 : f32
    %72 = vector.broadcast %cst_23 : f32 to vector<8x32xf32>
    %73 = arith.addf %71, %72 : vector<8x32xf32>
    %74 = vector.extract_strided_slice %68 {offsets = [0, 32], sizes = [8, 32], strides = [1, 1]} : vector<8x128xf32> to vector<8x32xf32>
    %cst_24 = arith.constant 5.000000e-01 : f32
    %75 = vector.broadcast %cst_24 : f32 to vector<8x32xf32>
    %76 = arith.mulf %75, %74 : vector<8x32xf32>
    %cst_25 = arith.constant 5.000000e-01 : f32
    %77 = vector.broadcast %cst_25 : f32 to vector<8x32xf32>
    %78 = arith.addf %76, %77 : vector<8x32xf32>
    %79 = vector.extract_strided_slice %68 {offsets = [0, 64], sizes = [8, 32], strides = [1, 1]} : vector<8x128xf32> to vector<8x32xf32>
    %80 = vector.extract_strided_slice %68 {offsets = [0, 96], sizes = [8, 32], strides = [1, 1]} : vector<8x128xf32> to vector<8x32xf32>
    %cst_26 = arith.constant 5.000000e-01 : f32
    %81 = vector.broadcast %cst_26 : f32 to vector<8x32xf32>
    %82 = arith.mulf %81, %80 : vector<8x32xf32>
    %cst_27 = arith.constant 5.000000e-01 : f32
    %83 = vector.broadcast %cst_27 : f32 to vector<8x32xf32>
    %84 = arith.addf %82, %83 : vector<8x32xf32>
    %85 = arith.mulf %78, %37 : vector<8x32xf32>
    %86 = arith.mulf %73, %79 : vector<8x32xf32>
    %87 = arith.addf %85, %86 : vector<8x32xf32>
    %88 = math.tanh %87 : vector<8x32xf32>
    %89 = arith.mulf %84, %88 : vector<8x32xf32>
    %90 = tpu.concatenate %89, %64 in 1 : vector<8x32xf32>, vector<8x32xf32> -> vector<8x64xf32>
    %cst_28 = arith.constant dense<0.000000e+00> : vector<8x128xf32>
    %91 = tpu.matmul %90, %2, %cst_28 {dimension_numbers = #tpu.dot_dimension_numbers<[1], [0], [0], [1], [0, 0, 1, 1], [], []>} : vector<8x64xf32>, vector<64x128xf32>, vector<8x128xf32> -> vector<8x128xf32>
    %92 = arith.addf %91, %7 : vector<8x128xf32>
    %93 = math.tanh %92 : vector<8x128xf32>
    %94 = vector.extract_strided_slice %93 {offsets = [0, 0], sizes = [8, 32], strides = [1, 1]} : vector<8x128xf32> to vector<8x32xf32>
    %cst_29 = arith.constant 5.000000e-01 : f32
    %95 = vector.broadcast %cst_29 : f32 to vector<8x32xf32>
    %96 = arith.mulf %95, %94 : vector<8x32xf32>
    %cst_30 = arith.constant 5.000000e-01 : f32
    %97 = vector.broadcast %cst_30 : f32 to vector<8x32xf32>
    %98 = arith.addf %96, %97 : vector<8x32xf32>
    %99 = vector.extract_strided_slice %93 {offsets = [0, 32], sizes = [8, 32], strides = [1, 1]} : vector<8x128xf32> to vector<8x32xf32>
    %cst_31 = arith.constant 5.000000e-01 : f32
    %100 = vector.broadcast %cst_31 : f32 to vector<8x32xf32>
    %101 = arith.mulf %100, %99 : vector<8x32xf32>
    %cst_32 = arith.constant 5.000000e-01 : f32
    %102 = vector.broadcast %cst_32 : f32 to vector<8x32xf32>
    %103 = arith.addf %101, %102 : vector<8x32xf32>
    %104 = vector.extract_strided_slice %93 {offsets = [0, 64], sizes = [8, 32], strides = [1, 1]} : vector<8x128xf32> to vector<8x32xf32>
    %105 = vector.extract_strided_slice %93 {offsets = [0, 96], sizes = [8, 32], strides = [1, 1]} : vector<8x128xf32> to vector<8x32xf32>
    %cst_33 = arith.constant 5.000000e-01 : f32
    %106 = vector.broadcast %cst_33 : f32 to vector<8x32xf32>
    %107 = arith.mulf %106, %105 : vector<8x32xf32>
    %cst_34 = arith.constant 5.000000e-01 : f32
    %108 = vector.broadcast %cst_34 : f32 to vector<8x32xf32>
    %109 = arith.addf %107, %108 : vector<8x32xf32>
    %110 = arith.mulf %103, %62 : vector<8x32xf32>
    %111 = arith.mulf %98, %104 : vector<8x32xf32>
    %112 = arith.addf %110, %111 : vector<8x32xf32>
    %113 = math.tanh %112 : vector<8x32xf32>
    %114 = arith.mulf %109, %113 : vector<8x32xf32>
    %115 = vector.extract_strided_slice %13 {offsets = [16, 0], sizes = [8, 128], strides = [1, 1]} : vector<64x128xf32> to vector<8x128xf32>
    %cst_35 = arith.constant dense<0.000000e+00> : vector<8x128xf32>
    %116 = tpu.matmul %89, %1, %cst_35 {dimension_numbers = #tpu.dot_dimension_numbers<[1], [0], [0], [1], [0, 0, 1, 1], [], []>} : vector<8x32xf32>, vector<32x128xf32>, vector<8x128xf32> -> vector<8x128xf32>
    %117 = arith.addf %115, %116 : vector<8x128xf32>
    %118 = math.tanh %117 : vector<8x128xf32>
    %119 = vector.extract_strided_slice %118 {offsets = [0, 0], sizes = [8, 32], strides = [1, 1]} : vector<8x128xf32> to vector<8x32xf32>
    %cst_36 = arith.constant 5.000000e-01 : f32
    %120 = vector.broadcast %cst_36 : f32 to vector<8x32xf32>
    %121 = arith.mulf %120, %119 : vector<8x32xf32>
    %cst_37 = arith.constant 5.000000e-01 : f32
    %122 = vector.broadcast %cst_37 : f32 to vector<8x32xf32>
    %123 = arith.addf %121, %122 : vector<8x32xf32>
    %124 = vector.extract_strided_slice %118 {offsets = [0, 32], sizes = [8, 32], strides = [1, 1]} : vector<8x128xf32> to vector<8x32xf32>
    %cst_38 = arith.constant 5.000000e-01 : f32
    %125 = vector.broadcast %cst_38 : f32 to vector<8x32xf32>
    %126 = arith.mulf %125, %124 : vector<8x32xf32>
    %cst_39 = arith.constant 5.000000e-01 : f32
    %127 = vector.broadcast %cst_39 : f32 to vector<8x32xf32>
    %128 = arith.addf %126, %127 : vector<8x32xf32>
    %129 = vector.extract_strided_slice %118 {offsets = [0, 64], sizes = [8, 32], strides = [1, 1]} : vector<8x128xf32> to vector<8x32xf32>
    %130 = vector.extract_strided_slice %118 {offsets = [0, 96], sizes = [8, 32], strides = [1, 1]} : vector<8x128xf32> to vector<8x32xf32>
    %cst_40 = arith.constant 5.000000e-01 : f32
    %131 = vector.broadcast %cst_40 : f32 to vector<8x32xf32>
    %132 = arith.mulf %131, %130 : vector<8x32xf32>
    %cst_41 = arith.constant 5.000000e-01 : f32
    %133 = vector.broadcast %cst_41 : f32 to vector<8x32xf32>
    %134 = arith.addf %132, %133 : vector<8x32xf32>
    %135 = arith.mulf %128, %87 : vector<8x32xf32>
    %136 = arith.mulf %123, %129 : vector<8x32xf32>
    %137 = arith.addf %135, %136 : vector<8x32xf32>
    %138 = math.tanh %137 : vector<8x32xf32>
    %139 = arith.mulf %134, %138 : vector<8x32xf32>
    %140 = tpu.concatenate %139, %114 in 1 : vector<8x32xf32>, vector<8x32xf32> -> vector<8x64xf32>
    %cst_42 = arith.constant dense<0.000000e+00> : vector<8x128xf32>
    %141 = tpu.matmul %140, %2, %cst_42 {dimension_numbers = #tpu.dot_dimension_numbers<[1], [0], [0], [1], [0, 0, 1, 1], [], []>} : vector<8x64xf32>, vector<64x128xf32>, vector<8x128xf32> -> vector<8x128xf32>
    %142 = arith.addf %141, %7 : vector<8x128xf32>
    %143 = math.tanh %142 : vector<8x128xf32>
    %144 = vector.extract_strided_slice %143 {offsets = [0, 0], sizes = [8, 32], strides = [1, 1]} : vector<8x128xf32> to vector<8x32xf32>
    %cst_43 = arith.constant 5.000000e-01 : f32
    %145 = vector.broadcast %cst_43 : f32 to vector<8x32xf32>
    %146 = arith.mulf %145, %144 : vector<8x32xf32>
    %cst_44 = arith.constant 5.000000e-01 : f32
    %147 = vector.broadcast %cst_44 : f32 to vector<8x32xf32>
    %148 = arith.addf %146, %147 : vector<8x32xf32>
    %149 = vector.extract_strided_slice %143 {offsets = [0, 32], sizes = [8, 32], strides = [1, 1]} : vector<8x128xf32> to vector<8x32xf32>
    %cst_45 = arith.constant 5.000000e-01 : f32
    %150 = vector.broadcast %cst_45 : f32 to vector<8x32xf32>
    %151 = arith.mulf %150, %149 : vector<8x32xf32>
    %cst_46 = arith.constant 5.000000e-01 : f32
    %152 = vector.broadcast %cst_46 : f32 to vector<8x32xf32>
    %153 = arith.addf %151, %152 : vector<8x32xf32>
    %154 = vector.extract_strided_slice %143 {offsets = [0, 64], sizes = [8, 32], strides = [1, 1]} : vector<8x128xf32> to vector<8x32xf32>
    %155 = vector.extract_strided_slice %143 {offsets = [0, 96], sizes = [8, 32], strides = [1, 1]} : vector<8x128xf32> to vector<8x32xf32>
    %cst_47 = arith.constant 5.000000e-01 : f32
    %156 = vector.broadcast %cst_47 : f32 to vector<8x32xf32>
    %157 = arith.mulf %156, %155 : vector<8x32xf32>
    %cst_48 = arith.constant 5.000000e-01 : f32
    %158 = vector.broadcast %cst_48 : f32 to vector<8x32xf32>
    %159 = arith.addf %157, %158 : vector<8x32xf32>
    %160 = arith.mulf %153, %112 : vector<8x32xf32>
    %161 = arith.mulf %148, %154 : vector<8x32xf32>
    %162 = arith.addf %160, %161 : vector<8x32xf32>
    %163 = math.tanh %162 : vector<8x32xf32>
    %164 = arith.mulf %159, %163 : vector<8x32xf32>
    %165 = vector.extract_strided_slice %13 {offsets = [24, 0], sizes = [8, 128], strides = [1, 1]} : vector<64x128xf32> to vector<8x128xf32>
    %cst_49 = arith.constant dense<0.000000e+00> : vector<8x128xf32>
    %166 = tpu.matmul %139, %1, %cst_49 {dimension_numbers = #tpu.dot_dimension_numbers<[1], [0], [0], [1], [0, 0, 1, 1], [], []>} : vector<8x32xf32>, vector<32x128xf32>, vector<8x128xf32> -> vector<8x128xf32>
    %167 = arith.addf %165, %166 : vector<8x128xf32>
    %168 = math.tanh %167 : vector<8x128xf32>
    %169 = vector.extract_strided_slice %168 {offsets = [0, 0], sizes = [8, 32], strides = [1, 1]} : vector<8x128xf32> to vector<8x32xf32>
    %cst_50 = arith.constant 5.000000e-01 : f32
    %170 = vector.broadcast %cst_50 : f32 to vector<8x32xf32>
    %171 = arith.mulf %170, %169 : vector<8x32xf32>
    %cst_51 = arith.constant 5.000000e-01 : f32
    %172 = vector.broadcast %cst_51 : f32 to vector<8x32xf32>
    %173 = arith.addf %171, %172 : vector<8x32xf32>
    %174 = vector.extract_strided_slice %168 {offsets = [0, 32], sizes = [8, 32], strides = [1, 1]} : vector<8x128xf32> to vector<8x32xf32>
    %cst_52 = arith.constant 5.000000e-01 : f32
    %175 = vector.broadcast %cst_52 : f32 to vector<8x32xf32>
    %176 = arith.mulf %175, %174 : vector<8x32xf32>
    %cst_53 = arith.constant 5.000000e-01 : f32
    %177 = vector.broadcast %cst_53 : f32 to vector<8x32xf32>
    %178 = arith.addf %176, %177 : vector<8x32xf32>
    %179 = vector.extract_strided_slice %168 {offsets = [0, 64], sizes = [8, 32], strides = [1, 1]} : vector<8x128xf32> to vector<8x32xf32>
    %180 = vector.extract_strided_slice %168 {offsets = [0, 96], sizes = [8, 32], strides = [1, 1]} : vector<8x128xf32> to vector<8x32xf32>
    %cst_54 = arith.constant 5.000000e-01 : f32
    %181 = vector.broadcast %cst_54 : f32 to vector<8x32xf32>
    %182 = arith.mulf %181, %180 : vector<8x32xf32>
    %cst_55 = arith.constant 5.000000e-01 : f32
    %183 = vector.broadcast %cst_55 : f32 to vector<8x32xf32>
    %184 = arith.addf %182, %183 : vector<8x32xf32>
    %185 = arith.mulf %178, %137 : vector<8x32xf32>
    %186 = arith.mulf %173, %179 : vector<8x32xf32>
    %187 = arith.addf %185, %186 : vector<8x32xf32>
    %188 = math.tanh %187 : vector<8x32xf32>
    %189 = arith.mulf %184, %188 : vector<8x32xf32>
    %190 = tpu.concatenate %189, %164 in 1 : vector<8x32xf32>, vector<8x32xf32> -> vector<8x64xf32>
    %cst_56 = arith.constant dense<0.000000e+00> : vector<8x128xf32>
    %191 = tpu.matmul %190, %2, %cst_56 {dimension_numbers = #tpu.dot_dimension_numbers<[1], [0], [0], [1], [0, 0, 1, 1], [], []>} : vector<8x64xf32>, vector<64x128xf32>, vector<8x128xf32> -> vector<8x128xf32>
    %192 = arith.addf %191, %7 : vector<8x128xf32>
    %193 = math.tanh %192 : vector<8x128xf32>
    %194 = vector.extract_strided_slice %193 {offsets = [0, 0], sizes = [8, 32], strides = [1, 1]} : vector<8x128xf32> to vector<8x32xf32>
    %cst_57 = arith.constant 5.000000e-01 : f32
    %195 = vector.broadcast %cst_57 : f32 to vector<8x32xf32>
    %196 = arith.mulf %195, %194 : vector<8x32xf32>
    %cst_58 = arith.constant 5.000000e-01 : f32
    %197 = vector.broadcast %cst_58 : f32 to vector<8x32xf32>
    %198 = arith.addf %196, %197 : vector<8x32xf32>
    %199 = vector.extract_strided_slice %193 {offsets = [0, 32], sizes = [8, 32], strides = [1, 1]} : vector<8x128xf32> to vector<8x32xf32>
    %cst_59 = arith.constant 5.000000e-01 : f32
    %200 = vector.broadcast %cst_59 : f32 to vector<8x32xf32>
    %201 = arith.mulf %200, %199 : vector<8x32xf32>
    %cst_60 = arith.constant 5.000000e-01 : f32
    %202 = vector.broadcast %cst_60 : f32 to vector<8x32xf32>
    %203 = arith.addf %201, %202 : vector<8x32xf32>
    %204 = vector.extract_strided_slice %193 {offsets = [0, 64], sizes = [8, 32], strides = [1, 1]} : vector<8x128xf32> to vector<8x32xf32>
    %205 = vector.extract_strided_slice %193 {offsets = [0, 96], sizes = [8, 32], strides = [1, 1]} : vector<8x128xf32> to vector<8x32xf32>
    %cst_61 = arith.constant 5.000000e-01 : f32
    %206 = vector.broadcast %cst_61 : f32 to vector<8x32xf32>
    %207 = arith.mulf %206, %205 : vector<8x32xf32>
    %cst_62 = arith.constant 5.000000e-01 : f32
    %208 = vector.broadcast %cst_62 : f32 to vector<8x32xf32>
    %209 = arith.addf %207, %208 : vector<8x32xf32>
    %210 = arith.mulf %203, %162 : vector<8x32xf32>
    %211 = arith.mulf %198, %204 : vector<8x32xf32>
    %212 = arith.addf %210, %211 : vector<8x32xf32>
    %213 = math.tanh %212 : vector<8x32xf32>
    %214 = arith.mulf %209, %213 : vector<8x32xf32>
    %215 = vector.extract_strided_slice %13 {offsets = [32, 0], sizes = [8, 128], strides = [1, 1]} : vector<64x128xf32> to vector<8x128xf32>
    %cst_63 = arith.constant dense<0.000000e+00> : vector<8x128xf32>
    %216 = tpu.matmul %189, %1, %cst_63 {dimension_numbers = #tpu.dot_dimension_numbers<[1], [0], [0], [1], [0, 0, 1, 1], [], []>} : vector<8x32xf32>, vector<32x128xf32>, vector<8x128xf32> -> vector<8x128xf32>
    %217 = arith.addf %215, %216 : vector<8x128xf32>
    %218 = math.tanh %217 : vector<8x128xf32>
    %219 = vector.extract_strided_slice %218 {offsets = [0, 0], sizes = [8, 32], strides = [1, 1]} : vector<8x128xf32> to vector<8x32xf32>
    %cst_64 = arith.constant 5.000000e-01 : f32
    %220 = vector.broadcast %cst_64 : f32 to vector<8x32xf32>
    %221 = arith.mulf %220, %219 : vector<8x32xf32>
    %cst_65 = arith.constant 5.000000e-01 : f32
    %222 = vector.broadcast %cst_65 : f32 to vector<8x32xf32>
    %223 = arith.addf %221, %222 : vector<8x32xf32>
    %224 = vector.extract_strided_slice %218 {offsets = [0, 32], sizes = [8, 32], strides = [1, 1]} : vector<8x128xf32> to vector<8x32xf32>
    %cst_66 = arith.constant 5.000000e-01 : f32
    %225 = vector.broadcast %cst_66 : f32 to vector<8x32xf32>
    %226 = arith.mulf %225, %224 : vector<8x32xf32>
    %cst_67 = arith.constant 5.000000e-01 : f32
    %227 = vector.broadcast %cst_67 : f32 to vector<8x32xf32>
    %228 = arith.addf %226, %227 : vector<8x32xf32>
    %229 = vector.extract_strided_slice %218 {offsets = [0, 64], sizes = [8, 32], strides = [1, 1]} : vector<8x128xf32> to vector<8x32xf32>
    %230 = vector.extract_strided_slice %218 {offsets = [0, 96], sizes = [8, 32], strides = [1, 1]} : vector<8x128xf32> to vector<8x32xf32>
    %cst_68 = arith.constant 5.000000e-01 : f32
    %231 = vector.broadcast %cst_68 : f32 to vector<8x32xf32>
    %232 = arith.mulf %231, %230 : vector<8x32xf32>
    %cst_69 = arith.constant 5.000000e-01 : f32
    %233 = vector.broadcast %cst_69 : f32 to vector<8x32xf32>
    %234 = arith.addf %232, %233 : vector<8x32xf32>
    %235 = arith.mulf %228, %187 : vector<8x32xf32>
    %236 = arith.mulf %223, %229 : vector<8x32xf32>
    %237 = arith.addf %235, %236 : vector<8x32xf32>
    %238 = math.tanh %237 : vector<8x32xf32>
    %239 = arith.mulf %234, %238 : vector<8x32xf32>
    %240 = tpu.concatenate %239, %214 in 1 : vector<8x32xf32>, vector<8x32xf32> -> vector<8x64xf32>
    %cst_70 = arith.constant dense<0.000000e+00> : vector<8x128xf32>
    %241 = tpu.matmul %240, %2, %cst_70 {dimension_numbers = #tpu.dot_dimension_numbers<[1], [0], [0], [1], [0, 0, 1, 1], [], []>} : vector<8x64xf32>, vector<64x128xf32>, vector<8x128xf32> -> vector<8x128xf32>
    %242 = arith.addf %241, %7 : vector<8x128xf32>
    %243 = math.tanh %242 : vector<8x128xf32>
    %244 = vector.extract_strided_slice %243 {offsets = [0, 0], sizes = [8, 32], strides = [1, 1]} : vector<8x128xf32> to vector<8x32xf32>
    %cst_71 = arith.constant 5.000000e-01 : f32
    %245 = vector.broadcast %cst_71 : f32 to vector<8x32xf32>
    %246 = arith.mulf %245, %244 : vector<8x32xf32>
    %cst_72 = arith.constant 5.000000e-01 : f32
    %247 = vector.broadcast %cst_72 : f32 to vector<8x32xf32>
    %248 = arith.addf %246, %247 : vector<8x32xf32>
    %249 = vector.extract_strided_slice %243 {offsets = [0, 32], sizes = [8, 32], strides = [1, 1]} : vector<8x128xf32> to vector<8x32xf32>
    %cst_73 = arith.constant 5.000000e-01 : f32
    %250 = vector.broadcast %cst_73 : f32 to vector<8x32xf32>
    %251 = arith.mulf %250, %249 : vector<8x32xf32>
    %cst_74 = arith.constant 5.000000e-01 : f32
    %252 = vector.broadcast %cst_74 : f32 to vector<8x32xf32>
    %253 = arith.addf %251, %252 : vector<8x32xf32>
    %254 = vector.extract_strided_slice %243 {offsets = [0, 64], sizes = [8, 32], strides = [1, 1]} : vector<8x128xf32> to vector<8x32xf32>
    %255 = vector.extract_strided_slice %243 {offsets = [0, 96], sizes = [8, 32], strides = [1, 1]} : vector<8x128xf32> to vector<8x32xf32>
    %cst_75 = arith.constant 5.000000e-01 : f32
    %256 = vector.broadcast %cst_75 : f32 to vector<8x32xf32>
    %257 = arith.mulf %256, %255 : vector<8x32xf32>
    %cst_76 = arith.constant 5.000000e-01 : f32
    %258 = vector.broadcast %cst_76 : f32 to vector<8x32xf32>
    %259 = arith.addf %257, %258 : vector<8x32xf32>
    %260 = arith.mulf %253, %212 : vector<8x32xf32>
    %261 = arith.mulf %248, %254 : vector<8x32xf32>
    %262 = arith.addf %260, %261 : vector<8x32xf32>
    %263 = math.tanh %262 : vector<8x32xf32>
    %264 = arith.mulf %259, %263 : vector<8x32xf32>
    %265 = vector.extract_strided_slice %13 {offsets = [40, 0], sizes = [8, 128], strides = [1, 1]} : vector<64x128xf32> to vector<8x128xf32>
    %cst_77 = arith.constant dense<0.000000e+00> : vector<8x128xf32>
    %266 = tpu.matmul %239, %1, %cst_77 {dimension_numbers = #tpu.dot_dimension_numbers<[1], [0], [0], [1], [0, 0, 1, 1], [], []>} : vector<8x32xf32>, vector<32x128xf32>, vector<8x128xf32> -> vector<8x128xf32>
    %267 = arith.addf %265, %266 : vector<8x128xf32>
    %268 = math.tanh %267 : vector<8x128xf32>
    %269 = vector.extract_strided_slice %268 {offsets = [0, 0], sizes = [8, 32], strides = [1, 1]} : vector<8x128xf32> to vector<8x32xf32>
    %cst_78 = arith.constant 5.000000e-01 : f32
    %270 = vector.broadcast %cst_78 : f32 to vector<8x32xf32>
    %271 = arith.mulf %270, %269 : vector<8x32xf32>
    %cst_79 = arith.constant 5.000000e-01 : f32
    %272 = vector.broadcast %cst_79 : f32 to vector<8x32xf32>
    %273 = arith.addf %271, %272 : vector<8x32xf32>
    %274 = vector.extract_strided_slice %268 {offsets = [0, 32], sizes = [8, 32], strides = [1, 1]} : vector<8x128xf32> to vector<8x32xf32>
    %cst_80 = arith.constant 5.000000e-01 : f32
    %275 = vector.broadcast %cst_80 : f32 to vector<8x32xf32>
    %276 = arith.mulf %275, %274 : vector<8x32xf32>
    %cst_81 = arith.constant 5.000000e-01 : f32
    %277 = vector.broadcast %cst_81 : f32 to vector<8x32xf32>
    %278 = arith.addf %276, %277 : vector<8x32xf32>
    %279 = vector.extract_strided_slice %268 {offsets = [0, 64], sizes = [8, 32], strides = [1, 1]} : vector<8x128xf32> to vector<8x32xf32>
    %280 = vector.extract_strided_slice %268 {offsets = [0, 96], sizes = [8, 32], strides = [1, 1]} : vector<8x128xf32> to vector<8x32xf32>
    %cst_82 = arith.constant 5.000000e-01 : f32
    %281 = vector.broadcast %cst_82 : f32 to vector<8x32xf32>
    %282 = arith.mulf %281, %280 : vector<8x32xf32>
    %cst_83 = arith.constant 5.000000e-01 : f32
    %283 = vector.broadcast %cst_83 : f32 to vector<8x32xf32>
    %284 = arith.addf %282, %283 : vector<8x32xf32>
    %285 = arith.mulf %278, %237 : vector<8x32xf32>
    %286 = arith.mulf %273, %279 : vector<8x32xf32>
    %287 = arith.addf %285, %286 : vector<8x32xf32>
    %288 = math.tanh %287 : vector<8x32xf32>
    %289 = arith.mulf %284, %288 : vector<8x32xf32>
    %290 = tpu.concatenate %289, %264 in 1 : vector<8x32xf32>, vector<8x32xf32> -> vector<8x64xf32>
    %cst_84 = arith.constant dense<0.000000e+00> : vector<8x128xf32>
    %291 = tpu.matmul %290, %2, %cst_84 {dimension_numbers = #tpu.dot_dimension_numbers<[1], [0], [0], [1], [0, 0, 1, 1], [], []>} : vector<8x64xf32>, vector<64x128xf32>, vector<8x128xf32> -> vector<8x128xf32>
    %292 = arith.addf %291, %7 : vector<8x128xf32>
    %293 = math.tanh %292 : vector<8x128xf32>
    %294 = vector.extract_strided_slice %293 {offsets = [0, 0], sizes = [8, 32], strides = [1, 1]} : vector<8x128xf32> to vector<8x32xf32>
    %cst_85 = arith.constant 5.000000e-01 : f32
    %295 = vector.broadcast %cst_85 : f32 to vector<8x32xf32>
    %296 = arith.mulf %295, %294 : vector<8x32xf32>
    %cst_86 = arith.constant 5.000000e-01 : f32
    %297 = vector.broadcast %cst_86 : f32 to vector<8x32xf32>
    %298 = arith.addf %296, %297 : vector<8x32xf32>
    %299 = vector.extract_strided_slice %293 {offsets = [0, 32], sizes = [8, 32], strides = [1, 1]} : vector<8x128xf32> to vector<8x32xf32>
    %cst_87 = arith.constant 5.000000e-01 : f32
    %300 = vector.broadcast %cst_87 : f32 to vector<8x32xf32>
    %301 = arith.mulf %300, %299 : vector<8x32xf32>
    %cst_88 = arith.constant 5.000000e-01 : f32
    %302 = vector.broadcast %cst_88 : f32 to vector<8x32xf32>
    %303 = arith.addf %301, %302 : vector<8x32xf32>
    %304 = vector.extract_strided_slice %293 {offsets = [0, 64], sizes = [8, 32], strides = [1, 1]} : vector<8x128xf32> to vector<8x32xf32>
    %305 = vector.extract_strided_slice %293 {offsets = [0, 96], sizes = [8, 32], strides = [1, 1]} : vector<8x128xf32> to vector<8x32xf32>
    %cst_89 = arith.constant 5.000000e-01 : f32
    %306 = vector.broadcast %cst_89 : f32 to vector<8x32xf32>
    %307 = arith.mulf %306, %305 : vector<8x32xf32>
    %cst_90 = arith.constant 5.000000e-01 : f32
    %308 = vector.broadcast %cst_90 : f32 to vector<8x32xf32>
    %309 = arith.addf %307, %308 : vector<8x32xf32>
    %310 = arith.mulf %303, %262 : vector<8x32xf32>
    %311 = arith.mulf %298, %304 : vector<8x32xf32>
    %312 = arith.addf %310, %311 : vector<8x32xf32>
    %313 = math.tanh %312 : vector<8x32xf32>
    %314 = arith.mulf %309, %313 : vector<8x32xf32>
    %315 = vector.extract_strided_slice %13 {offsets = [48, 0], sizes = [8, 128], strides = [1, 1]} : vector<64x128xf32> to vector<8x128xf32>
    %cst_91 = arith.constant dense<0.000000e+00> : vector<8x128xf32>
    %316 = tpu.matmul %289, %1, %cst_91 {dimension_numbers = #tpu.dot_dimension_numbers<[1], [0], [0], [1], [0, 0, 1, 1], [], []>} : vector<8x32xf32>, vector<32x128xf32>, vector<8x128xf32> -> vector<8x128xf32>
    %317 = arith.addf %315, %316 : vector<8x128xf32>
    %318 = math.tanh %317 : vector<8x128xf32>
    %319 = vector.extract_strided_slice %318 {offsets = [0, 0], sizes = [8, 32], strides = [1, 1]} : vector<8x128xf32> to vector<8x32xf32>
    %cst_92 = arith.constant 5.000000e-01 : f32
    %320 = vector.broadcast %cst_92 : f32 to vector<8x32xf32>
    %321 = arith.mulf %320, %319 : vector<8x32xf32>
    %cst_93 = arith.constant 5.000000e-01 : f32
    %322 = vector.broadcast %cst_93 : f32 to vector<8x32xf32>
    %323 = arith.addf %321, %322 : vector<8x32xf32>
    %324 = vector.extract_strided_slice %318 {offsets = [0, 32], sizes = [8, 32], strides = [1, 1]} : vector<8x128xf32> to vector<8x32xf32>
    %cst_94 = arith.constant 5.000000e-01 : f32
    %325 = vector.broadcast %cst_94 : f32 to vector<8x32xf32>
    %326 = arith.mulf %325, %324 : vector<8x32xf32>
    %cst_95 = arith.constant 5.000000e-01 : f32
    %327 = vector.broadcast %cst_95 : f32 to vector<8x32xf32>
    %328 = arith.addf %326, %327 : vector<8x32xf32>
    %329 = vector.extract_strided_slice %318 {offsets = [0, 64], sizes = [8, 32], strides = [1, 1]} : vector<8x128xf32> to vector<8x32xf32>
    %330 = vector.extract_strided_slice %318 {offsets = [0, 96], sizes = [8, 32], strides = [1, 1]} : vector<8x128xf32> to vector<8x32xf32>
    %cst_96 = arith.constant 5.000000e-01 : f32
    %331 = vector.broadcast %cst_96 : f32 to vector<8x32xf32>
    %332 = arith.mulf %331, %330 : vector<8x32xf32>
    %cst_97 = arith.constant 5.000000e-01 : f32
    %333 = vector.broadcast %cst_97 : f32 to vector<8x32xf32>
    %334 = arith.addf %332, %333 : vector<8x32xf32>
    %335 = arith.mulf %328, %287 : vector<8x32xf32>
    %336 = arith.mulf %323, %329 : vector<8x32xf32>
    %337 = arith.addf %335, %336 : vector<8x32xf32>
    %338 = math.tanh %337 : vector<8x32xf32>
    %339 = arith.mulf %334, %338 : vector<8x32xf32>
    %340 = tpu.concatenate %339, %314 in 1 : vector<8x32xf32>, vector<8x32xf32> -> vector<8x64xf32>
    %cst_98 = arith.constant dense<0.000000e+00> : vector<8x128xf32>
    %341 = tpu.matmul %340, %2, %cst_98 {dimension_numbers = #tpu.dot_dimension_numbers<[1], [0], [0], [1], [0, 0, 1, 1], [], []>} : vector<8x64xf32>, vector<64x128xf32>, vector<8x128xf32> -> vector<8x128xf32>
    %342 = arith.addf %341, %7 : vector<8x128xf32>
    %343 = math.tanh %342 : vector<8x128xf32>
    %344 = vector.extract_strided_slice %343 {offsets = [0, 0], sizes = [8, 32], strides = [1, 1]} : vector<8x128xf32> to vector<8x32xf32>
    %cst_99 = arith.constant 5.000000e-01 : f32
    %345 = vector.broadcast %cst_99 : f32 to vector<8x32xf32>
    %346 = arith.mulf %345, %344 : vector<8x32xf32>
    %cst_100 = arith.constant 5.000000e-01 : f32
    %347 = vector.broadcast %cst_100 : f32 to vector<8x32xf32>
    %348 = arith.addf %346, %347 : vector<8x32xf32>
    %349 = vector.extract_strided_slice %343 {offsets = [0, 32], sizes = [8, 32], strides = [1, 1]} : vector<8x128xf32> to vector<8x32xf32>
    %cst_101 = arith.constant 5.000000e-01 : f32
    %350 = vector.broadcast %cst_101 : f32 to vector<8x32xf32>
    %351 = arith.mulf %350, %349 : vector<8x32xf32>
    %cst_102 = arith.constant 5.000000e-01 : f32
    %352 = vector.broadcast %cst_102 : f32 to vector<8x32xf32>
    %353 = arith.addf %351, %352 : vector<8x32xf32>
    %354 = vector.extract_strided_slice %343 {offsets = [0, 64], sizes = [8, 32], strides = [1, 1]} : vector<8x128xf32> to vector<8x32xf32>
    %355 = vector.extract_strided_slice %343 {offsets = [0, 96], sizes = [8, 32], strides = [1, 1]} : vector<8x128xf32> to vector<8x32xf32>
    %cst_103 = arith.constant 5.000000e-01 : f32
    %356 = vector.broadcast %cst_103 : f32 to vector<8x32xf32>
    %357 = arith.mulf %356, %355 : vector<8x32xf32>
    %cst_104 = arith.constant 5.000000e-01 : f32
    %358 = vector.broadcast %cst_104 : f32 to vector<8x32xf32>
    %359 = arith.addf %357, %358 : vector<8x32xf32>
    %360 = arith.mulf %353, %312 : vector<8x32xf32>
    %361 = arith.mulf %348, %354 : vector<8x32xf32>
    %362 = arith.addf %360, %361 : vector<8x32xf32>
    %363 = math.tanh %362 : vector<8x32xf32>
    %364 = arith.mulf %359, %363 : vector<8x32xf32>
    %365 = vector.extract_strided_slice %13 {offsets = [56, 0], sizes = [8, 128], strides = [1, 1]} : vector<64x128xf32> to vector<8x128xf32>
    %cst_105 = arith.constant dense<0.000000e+00> : vector<8x128xf32>
    %366 = tpu.matmul %339, %1, %cst_105 {dimension_numbers = #tpu.dot_dimension_numbers<[1], [0], [0], [1], [0, 0, 1, 1], [], []>} : vector<8x32xf32>, vector<32x128xf32>, vector<8x128xf32> -> vector<8x128xf32>
    %367 = arith.addf %365, %366 : vector<8x128xf32>
    %368 = math.tanh %367 : vector<8x128xf32>
    %369 = vector.extract_strided_slice %368 {offsets = [0, 0], sizes = [8, 32], strides = [1, 1]} : vector<8x128xf32> to vector<8x32xf32>
    %cst_106 = arith.constant 5.000000e-01 : f32
    %370 = vector.broadcast %cst_106 : f32 to vector<8x32xf32>
    %371 = arith.mulf %370, %369 : vector<8x32xf32>
    %cst_107 = arith.constant 5.000000e-01 : f32
    %372 = vector.broadcast %cst_107 : f32 to vector<8x32xf32>
    %373 = arith.addf %371, %372 : vector<8x32xf32>
    %374 = vector.extract_strided_slice %368 {offsets = [0, 32], sizes = [8, 32], strides = [1, 1]} : vector<8x128xf32> to vector<8x32xf32>
    %cst_108 = arith.constant 5.000000e-01 : f32
    %375 = vector.broadcast %cst_108 : f32 to vector<8x32xf32>
    %376 = arith.mulf %375, %374 : vector<8x32xf32>
    %cst_109 = arith.constant 5.000000e-01 : f32
    %377 = vector.broadcast %cst_109 : f32 to vector<8x32xf32>
    %378 = arith.addf %376, %377 : vector<8x32xf32>
    %379 = vector.extract_strided_slice %368 {offsets = [0, 64], sizes = [8, 32], strides = [1, 1]} : vector<8x128xf32> to vector<8x32xf32>
    %380 = vector.extract_strided_slice %368 {offsets = [0, 96], sizes = [8, 32], strides = [1, 1]} : vector<8x128xf32> to vector<8x32xf32>
    %cst_110 = arith.constant 5.000000e-01 : f32
    %381 = vector.broadcast %cst_110 : f32 to vector<8x32xf32>
    %382 = arith.mulf %381, %380 : vector<8x32xf32>
    %cst_111 = arith.constant 5.000000e-01 : f32
    %383 = vector.broadcast %cst_111 : f32 to vector<8x32xf32>
    %384 = arith.addf %382, %383 : vector<8x32xf32>
    %385 = arith.mulf %378, %337 : vector<8x32xf32>
    %386 = arith.mulf %373, %379 : vector<8x32xf32>
    %387 = arith.addf %385, %386 : vector<8x32xf32>
    %388 = math.tanh %387 : vector<8x32xf32>
    %389 = arith.mulf %384, %388 : vector<8x32xf32>
    %390 = tpu.concatenate %389, %364 in 1 : vector<8x32xf32>, vector<8x32xf32> -> vector<8x64xf32>
    %cst_112 = arith.constant dense<0.000000e+00> : vector<8x128xf32>
    %391 = tpu.matmul %390, %2, %cst_112 {dimension_numbers = #tpu.dot_dimension_numbers<[1], [0], [0], [1], [0, 0, 1, 1], [], []>} : vector<8x64xf32>, vector<64x128xf32>, vector<8x128xf32> -> vector<8x128xf32>
    %392 = arith.addf %391, %7 : vector<8x128xf32>
    %393 = math.tanh %392 : vector<8x128xf32>
    %394 = vector.extract_strided_slice %393 {offsets = [0, 0], sizes = [8, 32], strides = [1, 1]} : vector<8x128xf32> to vector<8x32xf32>
    %cst_113 = arith.constant 5.000000e-01 : f32
    %395 = vector.broadcast %cst_113 : f32 to vector<8x32xf32>
    %396 = arith.mulf %395, %394 : vector<8x32xf32>
    %cst_114 = arith.constant 5.000000e-01 : f32
    %397 = vector.broadcast %cst_114 : f32 to vector<8x32xf32>
    %398 = arith.addf %396, %397 : vector<8x32xf32>
    %399 = vector.extract_strided_slice %393 {offsets = [0, 32], sizes = [8, 32], strides = [1, 1]} : vector<8x128xf32> to vector<8x32xf32>
    %cst_115 = arith.constant 5.000000e-01 : f32
    %400 = vector.broadcast %cst_115 : f32 to vector<8x32xf32>
    %401 = arith.mulf %400, %399 : vector<8x32xf32>
    %cst_116 = arith.constant 5.000000e-01 : f32
    %402 = vector.broadcast %cst_116 : f32 to vector<8x32xf32>
    %403 = arith.addf %401, %402 : vector<8x32xf32>
    %404 = vector.extract_strided_slice %393 {offsets = [0, 64], sizes = [8, 32], strides = [1, 1]} : vector<8x128xf32> to vector<8x32xf32>
    %405 = vector.extract_strided_slice %393 {offsets = [0, 96], sizes = [8, 32], strides = [1, 1]} : vector<8x128xf32> to vector<8x32xf32>
    %cst_117 = arith.constant 5.000000e-01 : f32
    %406 = vector.broadcast %cst_117 : f32 to vector<8x32xf32>
    %407 = arith.mulf %406, %405 : vector<8x32xf32>
    %cst_118 = arith.constant 5.000000e-01 : f32
    %408 = vector.broadcast %cst_118 : f32 to vector<8x32xf32>
    %409 = arith.addf %407, %408 : vector<8x32xf32>
    %410 = arith.mulf %403, %362 : vector<8x32xf32>
    %411 = arith.mulf %398, %404 : vector<8x32xf32>
    %412 = arith.addf %410, %411 : vector<8x32xf32>
    %413 = math.tanh %412 : vector<8x32xf32>
    %414 = arith.mulf %409, %413 : vector<8x32xf32>
    %415 = vector.broadcast %8 : vector<1x32xf32> to vector<8x32xf32>
    %416 = arith.mulf %414, %415 : vector<8x32xf32>
    %cst_119 = arith.constant dense<0.000000e+00> : vector<8xf32>
    %417 = vector.multi_reduction <add>, %416, %cst_119 [1] : vector<8x32xf32> to vector<8xf32>
    %418 = vector.shape_cast %417 : vector<8xf32> to vector<8x1xf32>
    %419 = vector.broadcast %9 : vector<1x1xf32> to vector<8x1xf32>
    %420 = arith.addf %418, %419 : vector<8x1xf32>
    %c0_120 = arith.constant 0 : index
    %c0_121 = arith.constant 0 : index
    %421 = vector.load %arg2[%c0_120, %c0_121] : memref<8x1xf32, #tpu.memory_space<vmem>>, vector<8x1xf32>
    tpu.vector_store %arg2[%c0_120, %c0_121], %420 {strides = array<i32>} : memref<8x1xf32, #tpu.memory_space<vmem>>, vector<8x1xf32>,
    return
  }
}

</mosaic_0001>

<bundles_post_ra>
// kernel: lstm_parameter_regression_forward.1
= control target key start
LH: loop header
LB: loop body
LE: loop exit
PB: predicated region body
PF: predicated region fallthrough
CT: control target
= control target key end

     0   :  { %7 = vsyncpa [#allocation3], 0  ;;  %s1021_s12 = smov [#allocation2]   ;;  %s1022_s14 = smov 128   ;;  %s1322_s0 = inlined_call_operand.vmem [shape: f32[64,16], index: 0, kind: input, shape index: {}]   ;;  %s1323_s1 = inlined_call_operand.hbm [shape: f32[120,128], index: 1, kind: input, shape index: {}]   ;;  %s1324_s2 = inlined_call_operand.vmem [shape: f32[8,1], index: 2, kind: output, shape index: {}]  }
   0x1   :  { %s14_s11 = sshll.u32 %s1323_s1, 4  ;;  %s16_s13 = sshll.u32 %s1021_s12, 4  ;;  %s15_s11 = int_to_ptr.hbm [resolvable:$true] %s14_s11  ;;  %s17_s13 = int_to_ptr.vmem [resolvable:$true] %s16_s13 }
   0x2   :  { %s1023_s15 = smov 8  }
   0x3   :  { %22 = dma.hbm_to_vmem [thread:$0]  %s15_s11, 1920, %s17_s13, [#allocation3], %s1022_s14, %s1022_s14, %s1023_s15  }
   0x4   :  { %1019 = dma.done.wait [#allocation3], 1920  }
   0x5   :  { %1020 = vsyncadd [#allocation3], 4294965376  ;;  %v28_v0 = vld [vmem:[#allocation2 + $0x8] sm:$0xff]  ;;  %v27_v1 = vld [vmem:[#allocation2] sm:$0xff]  ;;  %vm52_vm0 = vcmask 130048   ;;  %v1024_v8 = vmov 0.0  }
   0x6   :  { %922 = vmatpush.msra.mxu1 %v28_v0  ;;  %v50_v2 = vld [vmem:[%s1322_s0 + $0x38] sm:$0xff]  ;;  %v1049_v3 = vld [vmem:[#allocation2 + $0x28] sm:$0xff]  ;;  %91 = vmatpush.msra.mxu0 %v28_v0  ;;  %v43_v4 = vld [vmem:[%s1322_s0] sm:$0xff]  ;;  %s1025_s19 = smov 64   ;;  %s1026_s20 = smov 32   ;;  %vm118_vm1 = vcmask 261120  }
   0x7   :  { %226 = vmatpush.msra.mxu3 %v1049_v3  ;;  %v1056_v5 = vld [vmem:[#allocation2 + $0x20] sm:$0xff]  ;;  %v1061_v6 = vld [vmem:[#allocation2 + $0x18] sm:$0xff]  ;;  %v1065_v7 = vld [vmem:[#allocation2 + $0x10] sm:$0xff]  ;;  %vm168_vm2 = vcmask 523264   ;;  %vm892_vm3 = vcmask 7168  }
   0x8   :  { %923 = vmatpush.msra.mxu1 %v27_v1  ;;  %92 = vmatpush.msra.mxu0 %v27_v1  ;;  %v1074_v9 = vld [vmem:[#allocation2 + $0x70] sm:$0xff]  ;;  %v1088_v25 = vld [vmem:[#allocation2 + $0x68] sm:$0xff]  ;;  %v1090_v26 = vld [vmem:[#allocation2 + $0x60] sm:$0xff] }
   0x9   :  { %906 = vmatmul.msk.f32.vlgmr.msra.gmra.mxu1 %vm52_vm0, %v50_v2  ;;  %899 = vmatmul.msk.f32.vlgmr.msra.gmra.mxu0 %vm52_vm0, %v43_v4  ;;  %v1079_v12 = vperm.slane %v1074_v9, 0  ;;  %v1094_v27 = vld [vmem:[#allocation2 + $0x58] sm:$0xff]  ;;  %v1099_v28 = vld [vmem:[#allocation2 + $0x50] sm:$0xff]  ;;  %v1104_v29 = vld [vmem:[#allocation2 + $0x48] sm:$0xff]  ;;  %v1166_v42 = vperm.slane %v1074_v9, 1 }
   0xa   :  { %134 = vmatpush.msrb.mxu1 %v1049_v3  ;;  %227 = vmatpush.msra.mxu3 %v1056_v5  ;;  %v1109_v30 = vld [vmem:[#allocation2 + $0x40] sm:$0xff]  ;;  %v1114_v31 = vld [vmem:[#allocation2 + $0x38] sm:$0xff]  ;;  %v1124_v34 = vld [vmem:[#allocation2 + $0x30] sm:$0xff] }
   0xb   :  { %180 = vmatpush.msra.mxu2 %v1088_v25  ;;  %845 = vmatpush.msrb.mxu0 %v1088_v25  ;;  %v44_v35 = vld [vmem:[%s1322_s0 + $0x8] sm:$0xff]  ;;  %v45_v4 = vld [vmem:[%s1322_s0 + $0x10] sm:$0xff] }
   0xc   :  { %135 = vmatpush.msrb.mxu1 %v1056_v5  ;;  %228 = vmatpush.msra.mxu3 %v1061_v6 }
   0xd   :  { %181 = vmatpush.msra.mxu2 %v1090_v26  ;;  %846 = vmatpush.msrb.mxu0 %v1090_v26 }
   0xe   :  { %136 = vmatpush.msrb.mxu1 %v1061_v6  ;;  %229 = vmatpush.msra.mxu3 %v1065_v7 }
   0xf   :  { %182 = vmatpush.msra.mxu2 %v1094_v27  ;;  %847 = vmatpush.msrb.mxu0 %v1094_v27 }
  0x10   :  { %321 = vmatpush.msrb.mxu3 %v1049_v3  ;;  %137 = vmatpush.msrb.mxu1 %v1065_v7 }
  0x11   :  { %138 = vmatmul.f32.vlgmr.msrb.gmra.mxu1 %v1024_v8  ;;  %183 = vmatpush.msra.mxu2 %v1099_v28 }
  0x12   :  { %322 = vmatpush.msrb.mxu3 %v1056_v5  ;;  %275 = vmatpush.msra.mxu1 %v1088_v25 }
  0x13   :  { %848 = vmatpush.msrb.mxu0 %v1099_v28  ;;  %184 = vmatpush.msra.mxu2 %v1104_v29 }
  0x14   :  { %323 = vmatpush.msrb.mxu3 %v1061_v6  ;;  %276 = vmatpush.msra.mxu1 %v1090_v26 }
  0x15   :  { %849 = vmatpush.msrb.mxu0 %v1104_v29  ;;  %185 = vmatpush.msra.mxu2 %v1109_v30 }
  0x16   :  { %324 = vmatpush.msrb.mxu3 %v1065_v7  ;;  %277 = vmatpush.msra.mxu1 %v1094_v27 }
  0x17   :  { %850 = vmatpush.msrb.mxu0 %v1109_v30  ;;  %186 = vmatpush.msra.mxu2 %v1114_v31 }
  0x18   :  { %278 = vmatpush.msra.mxu1 %v1099_v28  ;;  %900 = vmatmul.msk.f32.gmra.mxu0 %vm52_vm0, %v44_v35 }
  0x19   :  { %851 = vmatpush.msrb.mxu0 %v1114_v31  ;;  %187 = vmatpush.msra.mxu2 %v1124_v34 }
  0x1a   :  { %279 = vmatpush.msra.mxu1 %v1104_v29 }
  0x1b   :  { %370 = vmatpush.msrb.mxu2 %v1088_v25  ;;  %852 = vmatpush.msrb.mxu0 %v1124_v34 }
  0x1c   :  { %280 = vmatpush.msra.mxu1 %v1109_v30 }
  0x1d   :  { %371 = vmatpush.msrb.mxu2 %v1090_v26 }
  0x1e   :  { %281 = vmatpush.msra.mxu1 %v1114_v31 }
  0x1f   :  { %372 = vmatpush.msrb.mxu2 %v1094_v27 }
  0x20   :  { %282 = vmatpush.msra.mxu1 %v1124_v34  ;;  %901 = vmatmul.msk.f32.gmra.mxu0 %vm52_vm0, %v45_v4 }
  0x21   :  { %373 = vmatpush.msrb.mxu2 %v1099_v28 }
  0x22   :  { %465 = vmatpush.msrb.mxu1 %v1088_v25 }
  0x23   :  { %374 = vmatpush.msrb.mxu2 %v1104_v29 }
  0x24   :  { %466 = vmatpush.msrb.mxu1 %v1090_v26 }
  0x25   :  { %375 = vmatpush.msrb.mxu2 %v1109_v30 }
  0x26   :  { %467 = vmatpush.msrb.mxu1 %v1094_v27 }
  0x27   :  { %376 = vmatpush.msrb.mxu2 %v1114_v31 }
  0x28   :  { %468 = vmatpush.msrb.mxu1 %v1099_v28 }
  0x29   :  { %377 = vmatpush.msrb.mxu2 %v1124_v34 }
  0x2a   :  { %469 = vmatpush.msrb.mxu1 %v1104_v29 }
  0x2c   :  { %470 = vmatpush.msrb.mxu1 %v1109_v30 }
  0x2e   :  { %471 = vmatpush.msrb.mxu1 %v1114_v31 }
  0x30   :  { %472 = vmatpush.msrb.mxu1 %v1124_v34 }
  0x86   :  { %v1076_v10 = vpop.f32.mrf.mxu1  ;;  %v94_v11 = vpop.f32.mrf.mxu0 }
  0x87   :  { %v95_v13 = vadd.f32 %v94_v11, %v1079_v12 }
  0x8e   :  { %v139_v14 = vpop.f32.mrf.mxu1 }
  0x8f   :  { %v142_v15 = vadd.f32 %v139_v14, %v95_v13 }
  0x91   :  { %931 = vtanh.f32 %v142_v15 }
  0x95   :  { %v97_v38 = vpop.f32.mrf.mxu0 }
  0x96   :  { %v98_v39 = vadd.f32 %v97_v38, %v1079_v12 }
  0x97   :  { %v932_v16 = vpop.eup %931 }
  0x98   :  { %148 = vrot.lane.b32.xlu0 %v932_v16, %s1025_s19  ;;  %v144_v17 = vmul.f32 0.5, %v932_v16 }
  0x9a   :  { %v145_v18 = vadd.f32 0.5, %v144_v17 }
  0x9c   :  { %v146_v21 = vmul.f32 0.0, %v145_v18 }
  0x9d   :  { %v100_v14 = vpop.f32.mrf.mxu0 }
  0x9e   :  { %v101_v15 = vadd.f32 %v100_v14, %v1079_v12 }
 0x10a   :  { %v149_v19 = vpop.permute.xlu0 %148 }
 0x10b   :  { %v151_v20 = vmul.f32 %v149_v19, %v145_v18 }
 0x10d   :  { %153 = vrot.lane.b32.xlu0 %v151_v20, %s1026_s20 }
 0x17f   :  { %v154_v22 = vpop.permute.xlu0 %153 }
 0x180   :  { %v1084_v23 = vadd.f32 %v154_v22, %v146_v21 }
 0x182   :  { %933 = vtanh.f32 %v1084_v23 }
 0x188   :  { %v934_v24 = vpop.eup %933 }
 0x189   :  { %159 = vrot.lane.b32.xlu1 %v934_v24, %s1025_s19 }
 0x1fb   :  { %v160_v32 = vpop.permute.xlu1 %159 }
 0x1fc   :  { %v162_v33 = vmul.f32 %v160_v32, %v145_v18 }
 0x1fe   :  { %164 = vrot.lane.b32.xlu1 %v162_v33, %s1026_s20 }
 0x270   :  { %v165_v36 = vpop.permute.xlu1 %164 }
 0x271   :  { %908 = vmatmul.msk.f32.vlgmr.msra.gmra.mxu3 %vm118_vm1, %v165_v36  ;;  %v167_v37 = vsel %vm118_vm1, %v165_v36, 0.0 }
 0x272   :  { %907 = vmatmul.msk.f32.vlgmr.msra.gmra.mxu2 %vm168_vm2, %v167_v37  ;;  %416 = vmatpush.msra.mxu3 %v1049_v3 }
 0x273   :  { %560 = vmatpush.msra.mxu2 %v1088_v25 }
 0x274   :  { %417 = vmatpush.msra.mxu3 %v1056_v5 }
 0x275   :  { %561 = vmatpush.msra.mxu2 %v1090_v26 }
 0x276   :  { %418 = vmatpush.msra.mxu3 %v1061_v6 }
 0x277   :  { %562 = vmatpush.msra.mxu2 %v1094_v27 }
 0x278   :  { %419 = vmatpush.msra.mxu3 %v1065_v7 }
 0x279   :  { %563 = vmatpush.msra.mxu2 %v1099_v28 }
 0x27b   :  { %564 = vmatpush.msra.mxu2 %v1104_v29 }
 0x27d   :  { %565 = vmatpush.msra.mxu2 %v1109_v30 }
 0x27f   :  { %566 = vmatpush.msra.mxu2 %v1114_v31 }
 0x281   :  { %567 = vmatpush.msra.mxu2 %v1124_v34 }
 0x2f4   :  { %v231_v40 = vpop.f32.mrf.mxu3 }
 0x2f5   :  { %v234_v41 = vadd.f32 %v231_v40, %v98_v39  ;;  %v189_v43 = vpop.f32.mrf.mxu2 }
 0x2f6   :  { %v190_v44 = vadd.f32 %v189_v43, %v1166_v42 }
 0x2f7   :  { %935 = vtanh.f32 %v234_v41 }
 0x2f8   :  { %937 = vtanh.f32 %v190_v44 }
 0x2fd   :  { %v936_v45 = vpop.eup %935 }
 0x2fe   :  { %240 = vrot.lane.b32.xlu2 %v936_v45, %s1025_s19  ;;  %v938_v46 = vpop.eup %937  ;;  %v236_v47 = vmul.f32 0.5, %v936_v45 }
 0x2ff   :  { %v193_v51 = vmul.f32 0.5, %v938_v46 }
 0x300   :  { %v237_v48 = vadd.f32 0.5, %v236_v47 }
 0x301   :  { %v194_v52 = vadd.f32 0.5, %v193_v51  ;;  %v46_v51 = vld [vmem:[%s1322_s0 + $0x18] sm:$0xff] }
 0x302   :  { %v238_v55 = vmul.f32 %v237_v48, %v1084_v23  ;;  %902 = vmatmul.msk.f32.gmra.mxu0 %vm52_vm0, %v46_v51 }
 0x303   :  { %v195_v58 = vmul.f32 0.0, %v194_v52 }
 0x306   :  { %197 = vrot.lane.b32.xlu2 %v938_v46, %s1025_s19 }
 0x358   :  { %v241_v49 = vpop.permute.xlu2 %240 }
 0x359   :  { %v243_v50 = vmul.f32 %v241_v49, %v237_v48 }
 0x35b   :  { %245 = vrot.lane.b32.xlu0 %v243_v50, %s1026_s20 }
 0x360   :  { %v198_v53 = vpop.permute.xlu2 %197 }
 0x361   :  { %v200_v54 = vmul.f32 %v198_v53, %v194_v52 }
 0x363   :  { %202 = vrot.lane.b32.xlu1 %v200_v54, %s1026_s20 }
 0x3cd   :  { %v246_v56 = vpop.permute.xlu0 %245 }
 0x3ce   :  { %v248_v57 = vadd.f32 %v246_v56, %v238_v55  ;;  %v103_v55 = vpop.f32.mrf.mxu0 }
 0x3cf   :  { %v104_v56 = vadd.f32 %v103_v55, %v1079_v12 }
 0x3d0   :  { %939 = vtanh.f32 %v248_v57 }
 0x3d5   :  { %v203_v59 = vpop.permute.xlu1 %202 }
 0x3d6   :  { %v940_v60 = vpop.eup %939  ;;  %v205_v61 = vadd.f32 %v203_v59, %v195_v58 }
 0x3d7   :  { %251 = vrot.lane.b32.xlu2 %v940_v60, %s1025_s19 }
 0x3d8   :  { %941 = vtanh.f32 %v205_v61 }
 0x3de   :  { %v942_v62 = vpop.eup %941 }
 0x3df   :  { %208 = vrot.lane.b32.xlu0 %v942_v62, %s1025_s19 }
 0x431   :  { %v252_v63 = vpop.permute.xlu2 %251 }
 0x432   :  { %v254_v0 = vmul.f32 %v252_v63, %v237_v48 }
 0x434   :  { %256 = vrot.lane.b32.xlu1 %v254_v0, %s1026_s20 }
 0x451   :  { %v209_v1 = vpop.permute.xlu0 %208 }
 0x452   :  { %v211_v2 = vmul.f32 %v209_v1, %v194_v52 }
 0x454   :  { %260 = vrot.lane.b32.xlu2 %v211_v2, %s1025_s19 }
 0x4a6   :  { %v257_v8 = vpop.permute.xlu1 %256 }
 0x4a7   :  { %910 = vmatmul.msk.f32.vlgmr.msrb.gmra.mxu3 %vm118_vm1, %v257_v8 }
 0x4a8   :  { %511 = vmatpush.msrb.mxu3 %v1049_v3 }
 0x4aa   :  { %512 = vmatpush.msrb.mxu3 %v1056_v5 }
 0x4ac   :  { %513 = vmatpush.msrb.mxu3 %v1061_v6 }
 0x4ae   :  { %v261_v11 = vpop.permute.xlu2 %260  ;;  %514 = vmatpush.msrb.mxu3 %v1065_v7 }
 0x4af   :  { %v263_v13 = vsel %vm118_vm1, %v257_v8, %v261_v11 }
 0x4b0   :  { %909 = vmatmul.msk.f32.vlgmr.msra.gmra.mxu1 %vm168_vm2, %v263_v13 }
 0x4b1   :  { %655 = vmatpush.msra.mxu1 %v1088_v25 }
 0x4b3   :  { %656 = vmatpush.msra.mxu1 %v1090_v26 }
 0x4b5   :  { %657 = vmatpush.msra.mxu1 %v1094_v27 }
 0x4b7   :  { %658 = vmatpush.msra.mxu1 %v1099_v28 }
 0x4b9   :  { %659 = vmatpush.msra.mxu1 %v1104_v29 }
 0x4bb   :  { %660 = vmatpush.msra.mxu1 %v1109_v30 }
 0x4bd   :  { %661 = vmatpush.msra.mxu1 %v1114_v31 }
 0x4bf   :  { %662 = vmatpush.msra.mxu1 %v1124_v34 }
 0x52a   :  { %v326_v16 = vpop.f32.mrf.mxu3 }
 0x52b   :  { %v329_v17 = vadd.f32 %v326_v16, %v101_v15 }
 0x52d   :  { %943 = vtanh.f32 %v329_v17  ;;  %v284_v18 = vpop.f32.mrf.mxu1 }
 0x52e   :  { %v285_v19 = vadd.f32 %v284_v18, %v1166_v42  ;;  %v47_v18 = vld [vmem:[%s1322_s0 + $0x20] sm:$0xff] }
 0x52f   :  { %903 = vmatmul.msk.f32.gmra.mxu0 %vm52_vm0, %v47_v18 }
 0x530   :  { %945 = vtanh.f32 %v285_v19 }
 0x533   :  { %v944_v20 = vpop.eup %943 }
 0x534   :  { %335 = vrot.lane.b32.xlu0 %v944_v20, %s1025_s19  ;;  %v331_v22 = vmul.f32 0.5, %v944_v20 }
 0x536   :  { %v946_v21 = vpop.eup %945  ;;  %v332_v24 = vadd.f32 0.5, %v331_v22 }
 0x537   :  { %292 = vrot.lane.b32.xlu1 %v946_v21, %s1025_s19  ;;  %v288_v23 = vmul.f32 0.5, %v946_v21 }
 0x538   :  { %v333_v38 = vmul.f32 %v332_v24, %v248_v57 }
 0x539   :  { %v289_v35 = vadd.f32 0.5, %v288_v23 }
 0x53b   :  { %v290_v43 = vmul.f32 %v289_v35, %v205_v61 }
 0x5a6   :  { %v336_v32 = vpop.permute.xlu0 %335 }
 0x5a7   :  { %v338_v33 = vmul.f32 %v336_v32, %v332_v24 }
 0x5a9   :  { %v293_v36 = vpop.permute.xlu1 %292  ;;  %340 = vrot.lane.b32.xlu2 %v338_v33, %s1026_s20 }
 0x5aa   :  { %v295_v37 = vmul.f32 %v293_v36, %v289_v35 }
 0x5ac   :  { %297 = vrot.lane.b32.xlu0 %v295_v37, %s1026_s20  ;;  %v106_v22 = vpop.f32.mrf.mxu0 }
 0x5ad   :  { %v107_v23 = vadd.f32 %v106_v22, %v1079_v12  ;;  %v49_v22 = vld [vmem:[%s1322_s0 + $0x30] sm:$0xff] }
 0x603   :  { %v341_v39 = vpop.permute.xlu2 %340 }
 0x604   :  { %v343_v40 = vadd.f32 %v341_v39, %v333_v38 }
 0x606   :  { %947 = vtanh.f32 %v343_v40 }
 0x60c   :  { %v948_v41 = vpop.eup %947 }
 0x60d   :  { %346 = vrot.lane.b32.xlu1 %v948_v41, %s1025_s19 }
 0x61e   :  { %v298_v44 = vpop.permute.xlu0 %297 }
 0x61f   :  { %v300_v45 = vadd.f32 %v298_v44, %v290_v43 }
 0x621   :  { %949 = vtanh.f32 %v300_v45 }
 0x627   :  { %v950_v46 = vpop.eup %949 }
 0x628   :  { %303 = vrot.lane.b32.xlu2 %v950_v46, %s1025_s19 }
 0x67f   :  { %v347_v47 = vpop.permute.xlu1 %346 }
 0x680   :  { %v349_v48 = vmul.f32 %v347_v47, %v332_v24 }
 0x682   :  { %351 = vrot.lane.b32.xlu0 %v349_v48, %s1026_s20  ;;  %v304_v49 = vpop.permute.xlu2 %303 }
 0x683   :  { %v306_v50 = vmul.f32 %v304_v49, %v289_v35 }
 0x685   :  { %355 = vrot.lane.b32.xlu1 %v306_v50, %s1025_s19 }
 0x6f4   :  { %v352_v52 = vpop.permute.xlu0 %351 }
 0x6f5   :  { %912 = vmatmul.msk.f32.vlgmr.msra.gmra.mxu3 %vm118_vm1, %v352_v52 }
 0x6f6   :  { %606 = vmatpush.msra.mxu3 %v1049_v3 }
 0x6f7   :  { %v356_v53 = vpop.permute.xlu1 %355 }
 0x6f8   :  { %v358_v54 = vsel %vm118_vm1, %v352_v52, %v356_v53  ;;  %607 = vmatpush.msra.mxu3 %v1056_v5 }
 0x6f9   :  { %911 = vmatmul.msk.f32.vlgmr.msrb.gmra.mxu2 %vm168_vm2, %v358_v54 }
 0x6fa   :  { %608 = vmatpush.msra.mxu3 %v1061_v6  ;;  %750 = vmatpush.msrb.mxu2 %v1088_v25 }
 0x6fc   :  { %609 = vmatpush.msra.mxu3 %v1065_v7  ;;  %751 = vmatpush.msrb.mxu2 %v1090_v26 }
 0x6fe   :  { %752 = vmatpush.msrb.mxu2 %v1094_v27 }
 0x700   :  { %753 = vmatpush.msrb.mxu2 %v1099_v28 }
 0x702   :  { %754 = vmatpush.msrb.mxu2 %v1104_v29 }
 0x704   :  { %755 = vmatpush.msrb.mxu2 %v1109_v30 }
 0x706   :  { %756 = vmatpush.msrb.mxu2 %v1114_v31 }
 0x708   :  { %757 = vmatpush.msrb.mxu2 %v1124_v34 }
 0x778   :  { %v421_v25 = vpop.f32.mrf.mxu3 }
 0x779   :  { %v424_v57 = vadd.f32 %v421_v25, %v104_v56 }
 0x77b   :  { %951 = vtanh.f32 %v424_v57 }
 0x77c   :  { %v379_v58 = vpop.f32.mrf.mxu2 }
 0x77d   :  { %v380_v26 = vadd.f32 %v379_v58, %v1166_v42  ;;  %v48_v58 = vld [vmem:[%s1322_s0 + $0x28] sm:$0xff]  ;;  %s1027_s0 = smov 96  }
 0x77e   :  { %904 = vmatmul.msk.f32.gmra.mxu0 %vm52_vm0, %v48_v58 }
 0x77f   :  { %953 = vtanh.f32 %v380_v26 }
 0x781   :  { %v952_v27 = vpop.eup %951 }
 0x782   :  { %430 = vrot.lane.b32.xlu2 %v952_v27, %s1025_s19  ;;  %v426_v29 = vmul.f32 0.5, %v952_v27 }
 0x784   :  { %v427_v30 = vadd.f32 0.5, %v426_v29 }
 0x785   :  { %v954_v28 = vpop.eup %953 }
 0x786   :  { %387 = vrot.lane.b32.xlu0 %v954_v28, %s1025_s19  ;;  %v383_v59 = vmul.f32 0.5, %v954_v28  ;;  %v428_v63 = vmul.f32 %v427_v30, %v343_v40  ;;  %905 = vmatmul.msk.f32.gmra.mxu0 %vm52_vm0, %v49_v22 }
 0x788   :  { %v384_v60 = vadd.f32 0.5, %v383_v59 }
 0x78a   :  { %v385_v2 = vmul.f32 %v384_v60, %v300_v45 }
 0x7dc   :  { %v431_v31 = vpop.permute.xlu2 %430 }
 0x7dd   :  { %v433_v34 = vmul.f32 %v431_v31, %v427_v30 }
 0x7df   :  { %435 = vrot.lane.b32.xlu1 %v433_v34, %s1026_s20 }
 0x7f8   :  { %v388_v61 = vpop.permute.xlu0 %387 }
 0x7f9   :  { %v390_v62 = vmul.f32 %v388_v61, %v384_v60 }
 0x7fb   :  { %392 = vrot.lane.b32.xlu2 %v390_v62, %s1026_s20  ;;  %v109_v29 = vpop.f32.mrf.mxu0 }
 0x851   :  { %v436_v0 = vpop.permute.xlu1 %435 }
 0x852   :  { %v438_v1 = vadd.f32 %v436_v0, %v428_v63 }
 0x854   :  { %955 = vtanh.f32 %v438_v1 }
 0x855   :  { %v393_v4 = vpop.permute.xlu2 %392 }
 0x856   :  { %v395_v8 = vadd.f32 %v393_v4, %v385_v2 }
 0x858   :  { %957 = vtanh.f32 %v395_v8 }
 0x85a   :  { %v956_v11 = vpop.eup %955 }
 0x85b   :  { %441 = vrot.lane.b32.xlu0 %v956_v11, %s1025_s19 }
 0x85e   :  { %v958_v13 = vpop.eup %957 }
 0x85f   :  { %398 = vrot.lane.b32.xlu1 %v958_v13, %s1025_s19 }
 0x8cd   :  { %v442_v14 = vpop.permute.xlu0 %441 }
 0x8ce   :  { %v444_v15 = vmul.f32 %v442_v14, %v427_v30  ;;  %v110_v30 = vadd.f32 %v109_v29, %v1079_v12 }
 0x8d0   :  { %446 = vrot.lane.b32.xlu2 %v444_v15, %s1026_s20 }
 0x8d1   :  { %v399_v16 = vpop.permute.xlu1 %398 }
 0x8d2   :  { %v401_v17 = vmul.f32 %v399_v16, %v384_v60 }
 0x8d4   :  { %450 = vrot.lane.b32.xlu0 %v401_v17, %s1025_s19 }
 0x92a   :  { %v447_v19 = vpop.permute.xlu2 %446 }
 0x92b   :  { %914 = vmatmul.msk.f32.vlgmr.msrb.gmra.mxu3 %vm118_vm1, %v447_v19 }
 0x92c   :  { %701 = vmatpush.msrb.mxu3 %v1049_v3 }
 0x92e   :  { %702 = vmatpush.msrb.mxu3 %v1056_v5 }
 0x930   :  { %703 = vmatpush.msrb.mxu3 %v1061_v6 }
 0x932   :  { %704 = vmatpush.msrb.mxu3 %v1065_v7 }
 0x946   :  { %v451_v20 = vpop.permute.xlu0 %450 }
 0x947   :  { %v453_v21 = vsel %vm118_vm1, %v447_v19, %v451_v20 }
 0x948   :  { %913 = vmatmul.msk.f32.vlgmr.msrb.gmra.mxu1 %vm168_vm2, %v453_v21 }
 0x9ae   :  { %v516_v24 = vpop.f32.mrf.mxu3 }
 0x9af   :  { %v519_v32 = vadd.f32 %v516_v24, %v107_v23 }
 0x9b1   :  { %959 = vtanh.f32 %v519_v32 }
 0x9b7   :  { %v960_v33 = vpop.eup %959 }
 0x9b8   :  { %525 = vrot.lane.b32.xlu1 %v960_v33, %s1025_s19  ;;  %v521_v39 = vmul.f32 0.5, %v960_v33  ;;  %v112_v33 = vpop.f32.mrf.mxu0 }
 0x9ba   :  { %v522_v43 = vadd.f32 0.5, %v521_v39 }
 0x9bc   :  { %v523_v49 = vmul.f32 %v522_v43, %v438_v1 }
 0x9c5   :  { %v474_v35 = vpop.f32.mrf.mxu1 }
 0x9c6   :  { %v475_v36 = vadd.f32 %v474_v35, %v1166_v42 }
 0x9c8   :  { %961 = vtanh.f32 %v475_v36 }
 0x9ce   :  { %v962_v37 = vpop.eup %961 }
 0x9cf   :  { %482 = vrot.lane.b32.xlu2 %v962_v37, %s1025_s19  ;;  %v478_v38 = vmul.f32 0.5, %v962_v37  ;;  %v113_v37 = vadd.f32 %v112_v33, %v1079_v12 }
 0x9d1   :  { %v479_v40 = vadd.f32 0.5, %v478_v38 }
 0x9d3   :  { %v480_v47 = vmul.f32 %v479_v40, %v395_v8 }
 0xa29   :  { %v483_v41 = vpop.permute.xlu2 %482 }
 0xa2a   :  { %v485_v44 = vmul.f32 %v483_v41, %v479_v40  ;;  %v526_v45 = vpop.permute.xlu1 %525 }
 0xa2b   :  { %v528_v46 = vmul.f32 %v526_v45, %v522_v43 }
 0xa2c   :  { %487 = vrot.lane.b32.xlu1 %v485_v44, %s1026_s20 }
 0xa2d   :  { %530 = vrot.lane.b32.xlu0 %v528_v46, %s1026_s20 }
 0xa9e   :  { %v488_v48 = vpop.permute.xlu1 %487 }
 0xa9f   :  { %v490_v50 = vadd.f32 %v488_v48, %v480_v47  ;;  %v531_v51 = vpop.permute.xlu0 %530 }
 0xaa0   :  { %v533_v52 = vadd.f32 %v531_v51, %v523_v49 }
 0xaa1   :  { %963 = vtanh.f32 %v490_v50 }
 0xaa2   :  { %965 = vtanh.f32 %v533_v52 }
 0xaa7   :  { %v964_v53 = vpop.eup %963 }
 0xaa8   :  { %v966_v54 = vpop.eup %965  ;;  %493 = vrot.lane.b32.xlu0 %v964_v53, %s1025_s19 }
 0xaa9   :  { %536 = vrot.lane.b32.xlu2 %v966_v54, %s1025_s19 }
 0xb03   :  { %v537_v55 = vpop.permute.xlu2 %536 }
 0xb04   :  { %v539_v56 = vmul.f32 %v537_v55, %v522_v43 }
 0xb06   :  { %541 = vrot.lane.b32.xlu1 %v539_v56, %s1026_s20 }
 0xb1a   :  { %v494_v25 = vpop.permute.xlu0 %493 }
 0xb1b   :  { %v496_v57 = vmul.f32 %v494_v25, %v479_v40 }
 0xb1d   :  { %545 = vrot.lane.b32.xlu2 %v496_v57, %s1025_s19 }
 0xb77   :  { %v546_v26 = vpop.permute.xlu2 %545 }
 0xb78   :  { %v542_v27 = vpop.permute.xlu1 %541 }
 0xb79   :  { %v548_v28 = vsel %vm118_vm1, %v542_v27, %v546_v26  ;;  %916 = vmatmul.msk.f32.vlgmr.msra.gmra.mxu3 %vm118_vm1, %v542_v27 }
 0xb7a   :  { %915 = vmatmul.msk.f32.vlgmr.msra.gmra.mxu2 %vm168_vm2, %v548_v28  ;;  %796 = vmatpush.msra.mxu3 %v1049_v3 }
 0xb7c   :  { %797 = vmatpush.msra.mxu3 %v1056_v5 }
 0xb7e   :  { %798 = vmatpush.msra.mxu3 %v1061_v6 }
 0xb80   :  { %799 = vmatpush.msra.mxu3 %v1065_v7 }
 0xbfc   :  { %v611_v31 = vpop.f32.mrf.mxu3 }
 0xbfd   :  { %v614_v34 = vadd.f32 %v611_v31, %v110_v30  ;;  %v569_v59 = vpop.f32.mrf.mxu2 }
 0xbfe   :  { %v570_v60 = vadd.f32 %v569_v59, %v1166_v42 }
 0xbff   :  { %967 = vtanh.f32 %v614_v34  ;;  %v116_v34 = vadd.f32 %v1076_v10, %v1079_v12 }
 0xc00   :  { %969 = vtanh.f32 %v570_v60 }
 0xc05   :  { %v968_v61 = vpop.eup %967 }
 0xc06   :  { %v970_v62 = vpop.eup %969  ;;  %620 = vrot.lane.b32.xlu0 %v968_v61, %s1025_s19  ;;  %v616_v3 = vmul.f32 0.5, %v968_v61 }
 0xc07   :  { %577 = vrot.lane.b32.xlu1 %v970_v62, %s1025_s19  ;;  %v573_v5 = vmul.f32 0.5, %v970_v62 }
 0xc08   :  { %v617_v6 = vadd.f32 0.5, %v616_v3 }
 0xc09   :  { %v574_v63 = vadd.f32 0.5, %v573_v5 }
 0xc0a   :  { %v618_v4 = vmul.f32 %v617_v6, %v533_v52 }
 0xc0b   :  { %v575_v14 = vmul.f32 %v574_v63, %v490_v50 }
 0xc78   :  { %v621_v7 = vpop.permute.xlu0 %620 }
 0xc79   :  { %v623_v0 = vmul.f32 %v621_v7, %v617_v6  ;;  %v578_v1 = vpop.permute.xlu1 %577 }
 0xc7a   :  { %v580_v2 = vmul.f32 %v578_v1, %v574_v63 }
 0xc7b   :  { %625 = vrot.lane.b32.xlu2 %v623_v0, %s1026_s20 }
 0xc7c   :  { %582 = vrot.lane.b32.xlu0 %v580_v2, %s1026_s20 }
 0xcd5   :  { %v626_v8 = vpop.permute.xlu2 %625 }
 0xcd6   :  { %v628_v11 = vadd.f32 %v626_v8, %v618_v4 }
 0xcd8   :  { %971 = vtanh.f32 %v628_v11 }
 0xcde   :  { %v972_v13 = vpop.eup %971 }
 0xcdf   :  { %631 = vrot.lane.b32.xlu1 %v972_v13, %s1025_s19 }
 0xcee   :  { %v583_v15 = vpop.permute.xlu0 %582 }
 0xcef   :  { %v585_v16 = vadd.f32 %v583_v15, %v575_v14 }
 0xcf1   :  { %973 = vtanh.f32 %v585_v16 }
 0xcf7   :  { %v974_v17 = vpop.eup %973 }
 0xcf8   :  { %588 = vrot.lane.b32.xlu2 %v974_v17, %s1025_s19 }
 0xd51   :  { %v632_v18 = vpop.permute.xlu1 %631 }
 0xd52   :  { %v634_v19 = vmul.f32 %v632_v18, %v617_v6  ;;  %v589_v20 = vpop.permute.xlu2 %588 }
 0xd53   :  { %v591_v21 = vmul.f32 %v589_v20, %v574_v63 }
 0xd54   :  { %636 = vrot.lane.b32.xlu0 %v634_v19, %s1026_s20 }
 0xd55   :  { %640 = vrot.lane.b32.xlu1 %v591_v21, %s1025_s19 }
 0xdc6   :  { %v637_v23 = vpop.permute.xlu0 %636 }
 0xdc7   :  { %918 = vmatmul.msk.f32.vlgmr.msrb.gmra.mxu3 %vm118_vm1, %v637_v23  ;;  %v641_v24 = vpop.permute.xlu1 %640 }
 0xdc8   :  { %v643_v32 = vsel %vm118_vm1, %v637_v23, %v641_v24 }
 0xdc9   :  { %917 = vmatmul.msk.f32.vlgmr.msra.gmra.mxu1 %vm168_vm2, %v643_v32 }
 0xe46   :  { %v664_v35 = vpop.f32.mrf.mxu1 }
 0xe47   :  { %v665_v36 = vadd.f32 %v664_v35, %v1166_v42 }
 0xe49   :  { %975 = vtanh.f32 %v665_v36  ;;  %v877_v36 = vperm.slane %v1074_v9, 2 }
 0xe4a   :  { %v706_v38 = vpop.f32.mrf.mxu3 }
 0xe4b   :  { %v709_v39 = vadd.f32 %v706_v38, %v113_v37 }
 0xe4d   :  { %977 = vtanh.f32 %v709_v39 }
 0xe4f   :  { %v976_v40 = vpop.eup %975 }
 0xe50   :  { %672 = vrot.lane.b32.xlu2 %v976_v40, %s1025_s19  ;;  %v668_v43 = vmul.f32 0.5, %v976_v40 }
 0xe52   :  { %v669_v44 = vadd.f32 0.5, %v668_v43 }
 0xe53   :  { %v978_v41 = vpop.eup %977 }
 0xe54   :  { %715 = vrot.lane.b32.xlu0 %v978_v41, %s1025_s19  ;;  %v711_v47 = vmul.f32 0.5, %v978_v41  ;;  %v670_v51 = vmul.f32 %v669_v44, %v585_v16 }
 0xe56   :  { %v712_v48 = vadd.f32 0.5, %v711_v47 }
 0xe58   :  { %v713_v54 = vmul.f32 %v712_v48, %v628_v11 }
 0xeaa   :  { %v673_v45 = vpop.permute.xlu2 %672 }
 0xeab   :  { %v675_v46 = vmul.f32 %v673_v45, %v669_v44 }
 0xead   :  { %677 = vrot.lane.b32.xlu1 %v675_v46, %s1026_s20 }
 0xec6   :  { %v716_v49 = vpop.permute.xlu0 %715 }
 0xec7   :  { %v718_v50 = vmul.f32 %v716_v49, %v712_v48 }
 0xec9   :  { %720 = vrot.lane.b32.xlu2 %v718_v50, %s1026_s20 }
 0xf1f   :  { %v678_v52 = vpop.permute.xlu1 %677 }
 0xf20   :  { %v680_v53 = vadd.f32 %v678_v52, %v670_v51  ;;  %v890_v51 = vperm.slane %v1074_v9, 3 }
 0xf22   :  { %979 = vtanh.f32 %v680_v53 }
 0xf23   :  { %v721_v55 = vpop.permute.xlu2 %720 }
 0xf24   :  { %v723_v56 = vadd.f32 %v721_v55, %v713_v54 }
 0xf26   :  { %981 = vtanh.f32 %v723_v56 }
 0xf28   :  { %v980_v25 = vpop.eup %979 }
 0xf29   :  { %683 = vrot.lane.b32.xlu0 %v980_v25, %s1025_s19 }
 0xf2c   :  { %v982_v57 = vpop.eup %981 }
 0xf2d   :  { %726 = vrot.lane.b32.xlu1 %v982_v57, %s1025_s19 }
 0xf9b   :  { %v684_v58 = vpop.permute.xlu0 %683 }
 0xf9c   :  { %v686_v26 = vmul.f32 %v684_v58, %v669_v44 }
 0xf9e   :  { %735 = vrot.lane.b32.xlu0 %v686_v26, %s1025_s19 }
 0xf9f   :  { %v727_v27 = vpop.permute.xlu1 %726 }
 0xfa0   :  { %v729_v28 = vmul.f32 %v727_v27, %v712_v48 }
 0xfa2   :  { %731 = vrot.lane.b32.xlu2 %v729_v28, %s1026_s20 }
 0xffc   :  { %v732_v29 = vpop.permute.xlu2 %731 }
 0xffd   :  { %920 = vmatmul.msk.f32.vlgmr.msra.gmra.mxu3 %vm118_vm1, %v732_v29 }
0x1010   :  { %v736_v30 = vpop.permute.xlu0 %735 }
0x1011   :  { %v738_v31 = vsel %vm118_vm1, %v732_v29, %v736_v30 }
0x1012   :  { %919 = vmatmul.msk.f32.vlgmr.msrb.gmra.mxu2 %vm168_vm2, %v738_v31 }
0x1080   :  { %v801_v59 = vpop.f32.mrf.mxu3 }
0x1081   :  { %v804_v60 = vadd.f32 %v801_v59, %v116_v34 }
0x1083   :  { %983 = vtanh.f32 %v804_v60 }
0x1089   :  { %v984_v61 = vpop.eup %983 }
0x108a   :  { %810 = vrot.lane.b32.xlu2 %v984_v61, %s1025_s19  ;;  %v806_v6 = vmul.f32 0.5, %v984_v61 }
0x108c   :  { %v807_v7 = vadd.f32 0.5, %v806_v6 }
0x108e   :  { %v808_v4 = vmul.f32 %v807_v7, %v723_v56 }
0x1095   :  { %v759_v62 = vpop.f32.mrf.mxu2 }
0x1096   :  { %v760_v3 = vadd.f32 %v759_v62, %v1166_v42 }
0x1098   :  { %985 = vtanh.f32 %v760_v3 }
0x109e   :  { %v986_v5 = vpop.eup %985 }
0x109f   :  { %767 = vrot.lane.b32.xlu1 %v986_v5, %s1025_s19  ;;  %v763_v10 = vmul.f32 0.5, %v986_v5 }
0x10a1   :  { %v764_v12 = vadd.f32 0.5, %v763_v10 }
0x10a3   :  { %v765_v14 = vmul.f32 %v764_v12, %v680_v53 }
0x10e4   :  { %v811_v63 = vpop.permute.xlu2 %810 }
0x10e5   :  { %v813_v0 = vmul.f32 %v811_v63, %v807_v7 }
0x10e7   :  { %815 = vrot.lane.b32.xlu1 %v813_v0, %s1026_s20 }
0x1111   :  { %v768_v1 = vpop.permute.xlu1 %767 }
0x1112   :  { %v770_v2 = vmul.f32 %v768_v1, %v764_v12 }
0x1114   :  { %772 = vrot.lane.b32.xlu0 %v770_v2, %s1026_s20 }
0x1159   :  { %v816_v8 = vpop.permute.xlu1 %815 }
0x115a   :  { %v818_v11 = vadd.f32 %v816_v8, %v808_v4 }
0x115c   :  { %987 = vtanh.f32 %v818_v11 }
0x1162   :  { %v988_v13 = vpop.eup %987 }
0x1163   :  { %821 = vrot.lane.b32.xlu0 %v988_v13, %s1025_s19 }
0x1186   :  { %v773_v15 = vpop.permute.xlu0 %772 }
0x1187   :  { %v775_v16 = vadd.f32 %v773_v15, %v765_v14 }
0x1189   :  { %989 = vtanh.f32 %v775_v16 }
0x118f   :  { %v990_v17 = vpop.eup %989 }
0x1190   :  { %778 = vrot.lane.b32.xlu2 %v990_v17, %s1025_s19 }
0x11d5   :  { %v822_v18 = vpop.permute.xlu0 %821 }
0x11d6   :  { %v824_v19 = vmul.f32 %v822_v18, %v807_v7 }
0x11d8   :  { %826 = vrot.lane.b32.xlu1 %v824_v19, %s1026_s20 }
0x11ea   :  { %v779_v20 = vpop.permute.xlu2 %778 }
0x11eb   :  { %v781_v21 = vmul.f32 %v779_v20, %v764_v12 }
0x11ed   :  { %830 = vrot.lane.b32.xlu2 %v781_v21, %s1025_s19 }
0x1247   :  { %v831_v22 = vpop.permute.xlu2 %830 }
0x124a   :  { %v827_v23 = vpop.permute.xlu1 %826 }
0x124b   :  { %v833_v24 = vsel %vm118_vm1, %v827_v23, %v831_v22 }
0x124c   :  { %921 = vmatmul.msk.f32.vlgmr.msrb.gmra.mxu0 %vm168_vm2, %v833_v24 }
0x12c9   :  { %v854_v32 = vpop.f32.mrf.mxu0 }
0x12ca   :  { %v855_v33 = vadd.f32 %v854_v32, %v1166_v42 }
0x12cc   :  { %991 = vtanh.f32 %v855_v33 }
0x12d2   :  { %v992_v35 = vpop.eup %991 }
0x12d3   :  { %862 = vrot.lane.b32.xlu0 %v992_v35, %s1025_s19  ;;  %v858_v37 = vmul.f32 0.5, %v992_v35 }
0x12d5   :  { %v859_v38 = vadd.f32 0.5, %v858_v37 }
0x12d7   :  { %v860_v41 = vmul.f32 %v859_v38, %v775_v16 }
0x12db   :  { %879 = vrot.lane.b32.xlu0 %v877_v36, %s1027_s0 }
0x1345   :  { %v863_v39 = vpop.permute.xlu0 %862 }
0x1346   :  { %v865_v40 = vmul.f32 %v863_v39, %v859_v38 }
0x1348   :  { %867 = vrot.lane.b32.xlu1 %v865_v40, %s1026_s20 }
0x134d   :  { %v880_v46 = vpop.permute.xlu0 %879 }
0x13ba   :  { %v868_v43 = vpop.permute.xlu1 %867 }
0x13bb   :  { %v870_v44 = vadd.f32 %v868_v43, %v860_v41 }
0x13bd   :  { %993 = vtanh.f32 %v870_v44 }
0x13c3   :  { %v994_v45 = vpop.eup %993 }
0x13c4   :  { %873 = vrot.lane.b32.xlu2 %v994_v45, %s1025_s19 }
0x141e   :  { %v874_v42 = vpop.permute.xlu2 %873 }
0x141f   :  { %v876_v47 = vmul.f32 %v874_v42, %v859_v38 }
0x1421   :  { %v882_v48 = vmul.f32 %v880_v46, %v876_v47 }
0x1423   :  { %884 = vrot.lane.b32.xlu1 %v882_v48, %s1026_s20 }
0x1495   :  { %v885_v49 = vpop.permute.xlu1 %884 }
0x1496   :  { %v887_v50 = vsel %vm118_vm1, %v885_v49, 0.0 }
0x1497   :  { %888 = vadd.xlane.f32.xlu2 %v887_v50 }
0x150a   :  { %v889_v52 = vpop.xlane.xlu2 %888 }
0x150b   :  { %v891_v53 = vadd.f32 %v890_v51, %v889_v52 }
0x150d   :  { %893 = vst.msk [vmem:[%s1324_s2] sm:$0xff] %vm892_vm3, %v891_v53 }
0x150e   :  { %898 = vsyncpa [#allocation3], 1 }

</bundles_post_ra>
